<compile_context>
chip_gen: v6e
topology: v6e:2x2x1
jax: 0.10.0
libtpu: 0.0.40
codegen_flags: <defaults>
</compile_context>

<pallas_src>
import math
import functools

import numpy as np
import jax
import jax.numpy as jnp
from jax import lax
from jax.experimental import pallas as pl
from jax.experimental.pallas import tpu as pltpu

PAD = 0
LN_EPS = 1e-5
NEG_INF = -1e30


def _physical_vmem_bytes():
    try:
        return int(pltpu.get_tpu_info().vmem_capacity_bytes)
    except Exception:
        return 64 * 1024 * 1024          # conservative fallback (v7x per-core VMEM)


# Generation-aware scoped-VMEM budget: ~60% of physical VMEM, capped at 96 MiB
# (=> ~76 MiB on v5e/v6e with 128 MiB, ~38 MiB on v7x with 64 MiB).
_VMEM_LIMIT = int(min(_physical_vmem_bytes() * 0.6, 96 * 1024 * 1024))


def _compiler_params(dimension_semantics):
    return pltpu.CompilerParams(
        dimension_semantics=dimension_semantics,
        vmem_limit_bytes=_VMEM_LIMIT,
    )


_TILE_CANDIDATES = (1024, 512, 256, 128, 64, 32, 16, 8)


def _tile_rows(n_rows, bytes_per_row, resident_bytes):
    """Largest row tile dividing n_rows whose working set fits the VMEM budget."""
    budget = int(_VMEM_LIMIT * 0.85) - resident_bytes
    for t in _TILE_CANDIDATES:
        if n_rows % t == 0 and t * bytes_per_row <= budget:
            return t
    return n_rows      # block == full extent is always a legal BlockSpec


def _tile_inner(K):
    """d_inner chunk: a multiple of 128 dividing K, else the full extent."""
    for t in (2048, 1024, 512, 256, 128):
        if K % t == 0:
            return t
    return K


# ----------------------------------------------------------------------------
# Kernel 1: fused Q|K|V projection (one wide matmul), bf16 output slab.
# The 1/sqrt(d_k) attention scale is folded into the Q columns here, in f32,
# before the bf16 cast, so the attention kernel skips a per-head SxS scale.
# ----------------------------------------------------------------------------
def _qkv_kernel(x_ref, w_ref, b_ref, o_ref, *, nq, q_scale):
    x = x_ref[...].astype(jnp.bfloat16)
    acc = jnp.dot(x, w_ref[...], preferred_element_type=jnp.float32) + b_ref[...]
    col = lax.broadcasted_iota(jnp.int32, acc.shape, 1)
    acc = jnp.where(col < nq, acc * q_scale, acc)
    o_ref[...] = acc.astype(o_ref.dtype)


def qkv_proj(x2, w, b, nq, q_scale):
    M, D = x2.shape
    N = w.shape[1]
    # per-row bytes: f32 x tile + bf16 out tile, both double-buffered.
    tm = _tile_rows(M, bytes_per_row=2 * (4 * D + 2 * N),
                    resident_bytes=2 * (D * N * 2 + N * 4))
    kernel = functools.partial(_qkv_kernel, nq=nq, q_scale=q_scale)
    return pl.pallas_call(
        kernel,
        out_shape=jax.ShapeDtypeStruct((M, N), jnp.bfloat16),
        grid=(M // tm,),
        in_specs=[
            pl.BlockSpec((tm, D), lambda i: (i, 0)),
            pl.BlockSpec((D, N), lambda i: (0, 0)),
            pl.BlockSpec((1, N), lambda i: (0, 0)),
        ],
        out_specs=pl.BlockSpec((tm, N), lambda i: (i, 0)),
        compiler_params=_compiler_params(("parallel",)),
    )(x2, w, b)
    # TODO(synk): single-buffer the pinned weight blocks via
    # pipeline_mode=pl.Buffered(1) once confirmed in the deployed jax (VMEM on v7x).


# ----------------------------------------------------------------------------
# Kernel 2: fused multi-head attention + output projection + residual + LN.
# Per-head ref-slice loads; per-head context folded directly into the Wo
# matmul accumulator (no lane-dim concatenate, heads never leave VMEM).
# ----------------------------------------------------------------------------
def _attn_proj_ln_kernel(qkv_q_ref, qkv_kv_ref, bias_ref, res_ref, wo_ref,
                         bo_ref, g_ref, bt_ref, o_ref, *, n_head, d_k, d_v):
    nq = n_head * d_k
    bias = bias_ref[0]                      # (1, S) additive mask, bcast over rows
    acc = None
    for h in range(n_head):                 # static unrolled head loop
        qh = qkv_q_ref[0, :, h * d_k:(h + 1) * d_k]                     # (tq, dk) bf16 (pre-scaled)
        kh = qkv_kv_ref[0, :, nq + h * d_k:nq + (h + 1) * d_k]           # (S, dk)  bf16
        vh = qkv_kv_ref[0, :, 2 * nq + h * d_v:2 * nq + (h + 1) * d_v]   # (S, dv)  bf16
        # q @ k^T without a physical transpose (contract last dims of both).
        s = lax.dot_general(qh, kh, (((1,), (1,)), ((), ())),
                            preferred_element_type=jnp.float32) + bias
        s = s - jnp.max(s, axis=-1, keepdims=True)
        p = jnp.exp(s)
        p = p * pl.reciprocal(jnp.sum(p, axis=-1, keepdims=True), approx=True)
        ctx = jnp.dot(p.astype(jnp.bfloat16), vh,
                      preferred_element_type=jnp.float32)                # (tq, dv)
        part = jnp.dot(ctx.astype(jnp.bfloat16),
                       wo_ref[h * d_v:(h + 1) * d_v, :],
                       preferred_element_type=jnp.float32)               # (tq, D)
        acc = part if acc is None else acc + part
    y = acc + bo_ref[...] + res_ref[0]
    mean = jnp.mean(y, axis=-1, keepdims=True)
    var = jnp.mean((y - mean) ** 2, axis=-1, keepdims=True)
    o_ref[0] = (y - mean) * lax.rsqrt(var + LN_EPS) * g_ref[...] + bt_ref[...]
    # TODO(synk): for long sequences (S >= 2k on v7x's 64 MiB VMEM) switch to
    # flash-style KV streaming (kv grid axis + online-softmax m/l/acc scratch)
    # so the per-head (tq,S) score block and the (S, ncols) KV slab stay bounded.
    # TODO(synk): for production shapes, pad d_k / d_v / d_model to multiples of
    # 128 (zero-padded weights, masked LN) for lane-aligned slices and MXU depth.


def attn_proj_layernorm(qkv3, bias, res3, wo, bo, gamma, beta, n_head, d_k, d_v):
    B, S, ncols = qkv3.shape
    D = wo.shape[1]
    resident = 2 * (S * ncols * 2 + S * 4 + wo.size * 2) + 4 * 4 * D
    tq = _tile_rows(S, bytes_per_row=2 * (2 * ncols + 8 * D) + 4 * S,
                    resident_bytes=resident)
    kernel = functools.partial(_attn_proj_ln_kernel,
                               n_head=n_head, d_k=d_k, d_v=d_v)
    return pl.pallas_call(
        kernel,
        out_shape=jax.ShapeDtypeStruct((B, S, D), jnp.float32),
        grid=(B, S // tq),
        in_specs=[
            pl.BlockSpec((1, tq, ncols), lambda b, q: (b, q, 0)),   # query rows
            pl.BlockSpec((1, S, ncols), lambda b, q: (b, 0, 0)),    # key/value rows
            pl.BlockSpec((1, 1, S), lambda b, q: (b, 0, 0)),        # additive pad mask
            pl.BlockSpec((1, tq, D), lambda b, q: (b, q, 0)),       # residual
            pl.BlockSpec((wo.shape[0], D), lambda b, q: (0, 0)),
            pl.BlockSpec((1, D), lambda b, q: (0, 0)),
            pl.BlockSpec((1, D), lambda b, q: (0, 0)),
            pl.BlockSpec((1, D), lambda b, q: (0, 0)),
        ],
        out_specs=pl.BlockSpec((1, tq, D), lambda b, q: (b, q, 0)),
        input_output_aliases={3: 0},            # residual buffer -> output
        compiler_params=_compiler_params(("parallel", "parallel")),
    )(qkv3, qkv3, bias, res3, wo, bo, gamma, beta)


# ----------------------------------------------------------------------------
# Kernel 3: fused positionwise FFN + residual + LayerNorm, d_inner K-tiled.
# ----------------------------------------------------------------------------
def _ffn_add_ln_kernel(x_ref, w1_ref, b1_ref, w2_ref, b2_ref, g_ref, bt_ref,
                       o_ref, acc_ref):
    k = pl.program_id(1)

    @pl.when(k == 0)
    def _():
        acc_ref[...] = jnp.zeros_like(acc_ref)

    x = x_ref[...]
    h = jnp.dot(x.astype(jnp.bfloat16), w1_ref[...],
                preferred_element_type=jnp.float32) + b1_ref[...]
    h = jnp.maximum(h, 0.0)
    acc_ref[...] += jnp.dot(h.astype(jnp.bfloat16), w2_ref[...],
                            preferred_element_type=jnp.float32)

    @pl.when(k == pl.num_programs(1) - 1)
    def _():
        y = acc_ref[...] + b2_ref[...] + x
        mean = jnp.mean(y, axis=-1, keepdims=True)
        var = jnp.mean((y - mean) ** 2, axis=-1, keepdims=True)
        o_ref[...] = (y - mean) * lax.rsqrt(var + LN_EPS) * g_ref[...] + bt_ref[...]


def ffn_add_layernorm(x, w1, b1, w2, b2, gamma, beta):
    M, D = x.shape
    Dh = w1.shape[1]
    tk = _tile_inner(Dh)
    n_k = Dh // tk
    # per-row: x + out (f32, double-buffered) + f32 accumulator + f32 h chunk.
    tm = _tile_rows(M,
                    bytes_per_row=2 * (4 * D) + 2 * (4 * D) + 4 * D + 4 * tk,
                    resident_bytes=2 * 2 * (2 * D * tk) + 4 * (tk + 3 * D))
    return pl.pallas_call(
        _ffn_add_ln_kernel,
        out_shape=jax.ShapeDtypeStruct((M, D), jnp.float32),
        grid=(M // tm, n_k),
        in_specs=[
            pl.BlockSpec((tm, D), lambda i, k: (i, 0)),
            pl.BlockSpec((D, tk), lambda i, k: (0, k)),
            pl.BlockSpec((1, tk), lambda i, k: (0, k)),
            pl.BlockSpec((tk, D), lambda i, k: (k, 0)),
            pl.BlockSpec((1, D), lambda i, k: (0, 0)),
            pl.BlockSpec((1, D), lambda i, k: (0, 0)),
            pl.BlockSpec((1, D), lambda i, k: (0, 0)),
        ],
        out_specs=pl.BlockSpec((tm, D), lambda i, k: (i, 0)),
        scratch_shapes=[pltpu.VMEM((tm, D), jnp.float32)],
        input_output_aliases={0: 0},            # x / residual buffer -> output
        compiler_params=_compiler_params(("parallel", "arbitrary")),
    )(x, w1, b1, w2, b2, gamma, beta)


# ----------------------------------------------------------------------------
# Encoder forward (glue: embedding gathers + free reshapes, no transposes)
# ----------------------------------------------------------------------------
def encoder_layer(x2, bias, p, B, S, n_head, d_k, d_v):
    D = x2.shape[-1]
    nq = n_head * d_k
    q_scale = 1.0 / math.sqrt(d_k)

    qkv = qkv_proj(x2, p["w_qkv"], p["b_qkv"], nq, q_scale)      # (M, 2nq+nv) bf16
    ncols = qkv.shape[-1]
    qkv3 = qkv.reshape(B, S, ncols)                              # free reshape
    res3 = x2.reshape(B, S, D)

    x3 = attn_proj_layernorm(qkv3, bias, res3, p["wo"], p["bo"],
                             p["ln1_g"], p["ln1_b"], n_head, d_k, d_v)
    x2 = x3.reshape(B * S, D)

    x2 = ffn_add_layernorm(x2, p["w1"], p["b1"], p["w2"], p["b2"],
                           p["ln2_g"], p["ln2_b"])
    return x2


def encoder_forward(src_seq, src_pos, params, n_head, d_k, d_v):
    # enc_input = src_word_emb(src_seq) + position_enc(src_pos)
    x = params["word_emb"][src_seq] + params["pos_enc"][src_pos]   # (B,S,D)
    B, S = src_seq.shape
    D = x.shape[-1]
    # get_attn_padding_mask(src_seq, src_seq): key==PAD -> -inf additive bias
    bias = jnp.where(src_seq == PAD, NEG_INF, 0.0).astype(jnp.float32)[:, None, :]
    x2 = x.reshape(B * S, D).astype(jnp.float32)
    for layer_p in params["layers"]:
        x2 = encoder_layer(x2, bias, layer_p, B, S, n_head, d_k, d_v)
    return x2.reshape(B, S, D)


# ----------------------------------------------------------------------------
# Deterministic parameter construction
# ----------------------------------------------------------------------------
def position_encoding_init(n_position, d_pos_vec):
    pos = np.arange(n_position)[:, None].astype(np.float64)
    j = np.arange(d_pos_vec)[None, :].astype(np.float64)
    angle = pos / np.power(10000.0, 2.0 * (j // 2) / d_pos_vec)
    table = np.zeros((n_position, d_pos_vec), dtype=np.float64)
    table[1:, 0::2] = np.sin(angle[1:, 0::2])
    table[1:, 1::2] = np.cos(angle[1:, 1::2])                     # row 0 stays 0 (PAD)
    return jnp.asarray(table, jnp.float32)


def init_params(key, vocab, d_model, n_layers, n_head, d_k, d_v, d_inner,
                n_position=100):
    def norm(k, shape, s=0.05):
        return jax.random.normal(k, shape, jnp.float32) * s

    keys = jax.random.split(key, 1 + n_layers)
    params = {
        "word_emb": norm(keys[0], (vocab, d_model), 0.1),
        "pos_enc": position_encoding_init(n_position, d_model),
        "layers": [],
    }
    nq = n_head * d_k
    nv = n_head * d_v
    for li in range(n_layers):
        ks = jax.random.split(keys[1 + li], 6)
        wq = norm(ks[0], (d_model, nq))
        wk = norm(ks[1], (d_model, nq))
        wv = norm(ks[2], (d_model, nv))
        p = {
            # matmul weights stored bf16 (halved DMA, MXU-native); everything
            # touching LN / softmax / bias stays f32.
            "w_qkv": jnp.concatenate([wq, wk, wv], axis=1).astype(jnp.bfloat16),
            "b_qkv": jnp.zeros((1, 2 * nq + nv), jnp.float32),
            "wo": norm(ks[3], (nv, d_model)).astype(jnp.bfloat16),
            "bo": jnp.zeros((1, d_model), jnp.float32),
            "ln1_g": jnp.ones((1, d_model), jnp.float32),
            "ln1_b": jnp.zeros((1, d_model), jnp.float32),
            "w1": norm(ks[4], (d_model, d_inner)).astype(jnp.bfloat16),
            "b1": jnp.zeros((1, d_inner), jnp.float32),
            "w2": norm(ks[5], (d_inner, d_model)).astype(jnp.bfloat16),
            "b2": jnp.zeros((1, d_model), jnp.float32),
            "ln2_g": jnp.ones((1, d_model), jnp.float32),
            "ln2_b": jnp.zeros((1, d_model), jnp.float32),
        }
        params["layers"].append(p)
    return params


# ----------------------------------------------------------------------------
if __name__ == "__main__":
    # Small config consistent with the module (scaled down from 300/6/50/600).
    B, S = 2, 8
    VOCAB = 20
    D_MODEL = 48
    N_LAYERS = 2
    N_HEAD = 4
    D_K = D_V = 12
    D_INNER = 96

    key = jax.random.PRNGKey(0)
    params = init_params(key, VOCAB, D_MODEL, N_LAYERS, N_HEAD, D_K, D_V, D_INNER)

    # Token ids (0 == PAD) and positions (1-based, 0 at PAD) — deterministic.
    src_seq = jnp.array(
        [[3, 5, 7, 2, 9, 4, 6, 8],
         [11, 12, 13, 14, 0, 0, 0, 0]], dtype=jnp.int32)
    src_pos = jnp.array(
        [[1, 2, 3, 4, 5, 6, 7, 8],
         [1, 2, 3, 4, 0, 0, 0, 0]], dtype=jnp.int32)

    fwd = jax.jit(functools.partial(encoder_forward,
                                    n_head=N_HEAD, d_k=D_K, d_v=D_V))
    enc_output = fwd(src_seq, src_pos, params)
    jax.block_until_ready(enc_output)
    assert enc_output.shape == (B, S, D_MODEL)
    assert bool(jnp.all(jnp.isfinite(enc_output)))
    print("KERNEL_OK")
</pallas_src>

<mosaic_0001>
module attributes {stable_mosaic.version = 11 : i64} {
  func.func @_ffn_add_ln_kernel(%arg0: i32, %arg1: i32, %arg2: memref<16x48xf32, #tpu.memory_space<vmem>>, %arg3: memref<48x96xbf16, #tpu.memory_space<vmem>>, %arg4: memref<1x96xf32, #tpu.memory_space<vmem>>, %arg5: memref<96x48xbf16, #tpu.memory_space<vmem>>, %arg6: memref<1x48xf32, #tpu.memory_space<vmem>>, %arg7: memref<1x48xf32, #tpu.memory_space<vmem>>, %arg8: memref<1x48xf32, #tpu.memory_space<vmem>>, %arg9: memref<16x48xf32, #tpu.memory_space<vmem>>, %arg10: memref<16x48xf32, #tpu.memory_space<vmem>>) attributes {dimension_semantics = [#tpu.dimension_semantics<parallel>, #tpu.dimension_semantics<arbitrary>], iteration_bounds = array<i64: 1, 1>, scalar_prefetch = 0 : i64, scratch_operands = 1 : i64, tpu.core_type = #tpu.core_type<tc>, window_params = [{transform_indices = @transform_0, window_bounds = array<i64: 16, 48>}, {transform_indices = @transform_1, window_bounds = array<i64: 48, 96>}, {transform_indices = @transform_2, window_bounds = array<i64: 1, 96>}, {transform_indices = @transform_3, window_bounds = array<i64: 96, 48>}, {pipeline_mode = #tpu.pipeline_mode<synchronous>, transform_indices = @transform_4, window_bounds = array<i64: 1, 48>}, {pipeline_mode = #tpu.pipeline_mode<synchronous>, transform_indices = @transform_5, window_bounds = array<i64: 1, 48>}, {pipeline_mode = #tpu.pipeline_mode<synchronous>, transform_indices = @transform_6, window_bounds = array<i64: 1, 48>}, {transform_indices = @transform_7, window_bounds = array<i64: 16, 48>}]} {
    %c0_i32 = arith.constant 0 : i32
    %0 = arith.cmpi eq, %arg1, %c0_i32 : i32
    %1 = arith.extui %0 : i1 to i32
    %c0_i32_0 = arith.constant 0 : i32
    %2 = arith.cmpi ne, %1, %c0_i32_0 : i32
    scf.if %2 {
      %cst_16 = arith.constant 0.000000e+00 : f32
      %21 = vector.broadcast %cst_16 : f32 to vector<16x48xf32>
      %c0_17 = arith.constant 0 : index
      %c0_18 = arith.constant 0 : index
      %22 = vector.load %arg10[%c0_17, %c0_18] : memref<16x48xf32, #tpu.memory_space<vmem>>, vector<16x48xf32>
      tpu.vector_store %arg10[%c0_17, %c0_18], %21 {strides = array<i32>} : memref<16x48xf32, #tpu.memory_space<vmem>>, vector<16x48xf32>,
    } else {
    }
    %c0 = arith.constant 0 : index
    %c0_1 = arith.constant 0 : index
    %3 = vector.load %arg2[%c0, %c0_1] : memref<16x48xf32, #tpu.memory_space<vmem>>, vector<16x48xf32>
    %4 = arith.truncf %3 : vector<16x48xf32> to vector<16x48xbf16>
    %c0_2 = arith.constant 0 : index
    %c0_3 = arith.constant 0 : index
    %5 = vector.load %arg3[%c0_2, %c0_3] : memref<48x96xbf16, #tpu.memory_space<vmem>>, vector<48x96xbf16>
    %cst = arith.constant dense<0.000000e+00> : vector<16x96xf32>
    %6 = tpu.matmul %4, %5, %cst {dimension_numbers = #tpu.dot_dimension_numbers<[1], [0], [0], [1], [0, 0, 1, 1], [], []>} : vector<16x48xbf16>, vector<48x96xbf16>, vector<16x96xf32> -> vector<16x96xf32>
    %c0_4 = arith.constant 0 : index
    %c0_5 = arith.constant 0 : index
    %7 = vector.load %arg4[%c0_4, %c0_5] : memref<1x96xf32, #tpu.memory_space<vmem>>, vector<1x96xf32>
    %8 = vector.broadcast %7 : vector<1x96xf32> to vector<16x96xf32>
    %9 = arith.addf %6, %8 : vector<16x96xf32>
    %cst_6 = arith.constant 0.000000e+00 : f32
    %10 = vector.broadcast %cst_6 : f32 to vector<16x96xf32>
    %11 = arith.maximumf %9, %10 : vector<16x96xf32>
    %c0_7 = arith.constant 0 : index
    %c0_8 = arith.constant 0 : index
    %12 = vector.load %arg10[%c0_7, %c0_8] : memref<16x48xf32, #tpu.memory_space<vmem>>, vector<16x48xf32>
    %13 = arith.truncf %11 : vector<16x96xf32> to vector<16x96xbf16>
    %c0_9 = arith.constant 0 : index
    %c0_10 = arith.constant 0 : index
    %14 = vector.load %arg5[%c0_9, %c0_10] : memref<96x48xbf16, #tpu.memory_space<vmem>>, vector<96x48xbf16>
    %cst_11 = arith.constant dense<0.000000e+00> : vector<16x48xf32>
    %15 = tpu.matmul %13, %14, %cst_11 {dimension_numbers = #tpu.dot_dimension_numbers<[1], [0], [0], [1], [0, 0, 1, 1], [], []>} : vector<16x96xbf16>, vector<96x48xbf16>, vector<16x48xf32> -> vector<16x48xf32>
    %16 = arith.addf %12, %15 : vector<16x48xf32>
    %c0_12 = arith.constant 0 : index
    %c0_13 = arith.constant 0 : index
    %17 = vector.load %arg10[%c0_12, %c0_13] : memref<16x48xf32, #tpu.memory_space<vmem>>, vector<16x48xf32>
    tpu.vector_store %arg10[%c0_12, %c0_13], %16 {strides = array<i32>} : memref<16x48xf32, #tpu.memory_space<vmem>>, vector<16x48xf32>,
    %c0_i32_14 = arith.constant 0 : i32
    %18 = arith.cmpi eq, %arg1, %c0_i32_14 : i32
    %19 = arith.extui %18 : i1 to i32
    %c0_i32_15 = arith.constant 0 : i32
    %20 = arith.cmpi ne, %19, %c0_i32_15 : i32
    scf.if %20 {
      %c0_16 = arith.constant 0 : index
      %c0_17 = arith.constant 0 : index
      %21 = vector.load %arg10[%c0_16, %c0_17] : memref<16x48xf32, #tpu.memory_space<vmem>>, vector<16x48xf32>
      %c0_18 = arith.constant 0 : index
      %c0_19 = arith.constant 0 : index
      %22 = vector.load %arg6[%c0_18, %c0_19] : memref<1x48xf32, #tpu.memory_space<vmem>>, vector<1x48xf32>
      %23 = vector.broadcast %22 : vector<1x48xf32> to vector<16x48xf32>
      %24 = arith.addf %21, %23 : vector<16x48xf32>
      %25 = arith.addf %24, %3 : vector<16x48xf32>
      %cst_20 = arith.constant dense<0.000000e+00> : vector<16xf32>
      %26 = vector.multi_reduction <add>, %25, %cst_20 [1] : vector<16x48xf32> to vector<16xf32>
      %27 = vector.shape_cast %26 : vector<16xf32> to vector<16x1xf32>
      %cst_21 = arith.constant 4.800000e+01 : f32
      %28 = vector.broadcast %cst_21 : f32 to vector<16x1xf32>
      %29 = arith.divf %27, %28 : vector<16x1xf32>
      %30 = vector.broadcast %29 : vector<16x1xf32> to vector<16x48xf32>
      %31 = arith.subf %25, %30 : vector<16x48xf32>
      %32 = arith.mulf %31, %31 : vector<16x48xf32>
      %cst_22 = arith.constant dense<0.000000e+00> : vector<16xf32>
      %33 = vector.multi_reduction <add>, %32, %cst_22 [1] : vector<16x48xf32> to vector<16xf32>
      %34 = vector.shape_cast %33 : vector<16xf32> to vector<16x1xf32>
      %cst_23 = arith.constant 4.800000e+01 : f32
      %35 = vector.broadcast %cst_23 : f32 to vector<16x1xf32>
      %36 = arith.divf %34, %35 : vector<16x1xf32>
      %37 = vector.broadcast %29 : vector<16x1xf32> to vector<16x48xf32>
      %38 = arith.subf %25, %37 : vector<16x48xf32>
      %cst_24 = arith.constant 9.99999974E-6 : f32
      %39 = vector.broadcast %cst_24 : f32 to vector<16x1xf32>
      %40 = arith.addf %36, %39 : vector<16x1xf32>
      %41 = math.rsqrt %40 : vector<16x1xf32>
      %42 = vector.broadcast %41 : vector<16x1xf32> to vector<16x48xf32>
      %43 = arith.mulf %38, %42 : vector<16x48xf32>
      %c0_25 = arith.constant 0 : index
      %c0_26 = arith.constant 0 : index
      %44 = vector.load %arg7[%c0_25, %c0_26] : memref<1x48xf32, #tpu.memory_space<vmem>>, vector<1x48xf32>
      %45 = vector.broadcast %44 : vector<1x48xf32> to vector<16x48xf32>
      %46 = arith.mulf %43, %45 : vector<16x48xf32>
      %c0_27 = arith.constant 0 : index
      %c0_28 = arith.constant 0 : index
      %47 = vector.load %arg8[%c0_27, %c0_28] : memref<1x48xf32, #tpu.memory_space<vmem>>, vector<1x48xf32>
      %48 = vector.broadcast %47 : vector<1x48xf32> to vector<16x48xf32>
      %49 = arith.addf %46, %48 : vector<16x48xf32>
      %c0_29 = arith.constant 0 : index
      %c0_30 = arith.constant 0 : index
      %50 = vector.load %arg9[%c0_29, %c0_30] : memref<16x48xf32, #tpu.memory_space<vmem>>, vector<16x48xf32>
      tpu.vector_store %arg9[%c0_29, %c0_30], %49 {strides = array<i32>} : memref<16x48xf32, #tpu.memory_space<vmem>>, vector<16x48xf32>,
    } else {
    }
    return
  }
  func.func @transform_0(%arg0: i32, %arg1: i32) -> (i32, i32) {
    %c0_i32 = arith.constant 0 : i32
    %c0_i32_0 = arith.constant 0 : i32
    return %arg0, %c0_i32 : i32, i32
  }
  func.func @transform_1(%arg0: i32, %arg1: i32) -> (i32, i32) {
    %c0_i32 = arith.constant 0 : i32
    %c0_i32_0 = arith.constant 0 : i32
    return %c0_i32, %arg1 : i32, i32
  }
  func.func @transform_2(%arg0: i32, %arg1: i32) -> (i32, i32) {
    %c0_i32 = arith.constant 0 : i32
    %c0_i32_0 = arith.constant 0 : i32
    return %c0_i32, %arg1 : i32, i32
  }
  func.func @transform_3(%arg0: i32, %arg1: i32) -> (i32, i32) {
    %c0_i32 = arith.constant 0 : i32
    %c0_i32_0 = arith.constant 0 : i32
    return %arg1, %c0_i32 : i32, i32
  }
  func.func @transform_4(%arg0: i32, %arg1: i32) -> (i32, i32) {
    %c0_i32 = arith.constant 0 : i32
    %c0_i32_0 = arith.constant 0 : i32
    %c0_i32_1 = arith.constant 0 : i32
    return %c0_i32, %c0_i32_0 : i32, i32
  }
  func.func @transform_5(%arg0: i32, %arg1: i32) -> (i32, i32) {
    %c0_i32 = arith.constant 0 : i32
    %c0_i32_0 = arith.constant 0 : i32
    %c0_i32_1 = arith.constant 0 : i32
    return %c0_i32, %c0_i32_0 : i32, i32
  }
  func.func @transform_6(%arg0: i32, %arg1: i32) -> (i32, i32) {
    %c0_i32 = arith.constant 0 : i32
    %c0_i32_0 = arith.constant 0 : i32
    %c0_i32_1 = arith.constant 0 : i32
    return %c0_i32, %c0_i32_0 : i32, i32
  }
  func.func @transform_7(%arg0: i32, %arg1: i32) -> (i32, i32) {
    %c0_i32 = arith.constant 0 : i32
    %c0_i32_0 = arith.constant 0 : i32
    return %arg0, %c0_i32 : i32, i32
  }
}

module attributes {stable_mosaic.version = 11 : i64} {
  func.func @_qkv_kernel(%arg0: i32, %arg1: memref<16x48xf32, #tpu.memory_space<vmem>>, %arg2: memref<48x144xbf16, #tpu.memory_space<vmem>>, %arg3: memref<1x144xf32, #tpu.memory_space<vmem>>, %arg4: memref<16x144xbf16, #tpu.memory_space<vmem>>) attributes {dimension_semantics = [#tpu.dimension_semantics<parallel>], iteration_bounds = array<i64: 1>, scalar_prefetch = 0 : i64, scratch_operands = 0 : i64, tpu.core_type = #tpu.core_type<tc>, window_params = [{transform_indices = @transform_0, window_bounds = array<i64: 16, 48>}, {pipeline_mode = #tpu.pipeline_mode<synchronous>, transform_indices = @transform_1, window_bounds = array<i64: 48, 144>}, {pipeline_mode = #tpu.pipeline_mode<synchronous>, transform_indices = @transform_2, window_bounds = array<i64: 1, 144>}, {transform_indices = @transform_3, window_bounds = array<i64: 16, 144>}]} {
    %c0 = arith.constant 0 : index
    %c0_0 = arith.constant 0 : index
    %0 = vector.load %arg1[%c0, %c0_0] : memref<16x48xf32, #tpu.memory_space<vmem>>, vector<16x48xf32>
    %1 = arith.truncf %0 : vector<16x48xf32> to vector<16x48xbf16>
    %c0_1 = arith.constant 0 : index
    %c0_2 = arith.constant 0 : index
    %2 = vector.load %arg2[%c0_1, %c0_2] : memref<48x144xbf16, #tpu.memory_space<vmem>>, vector<48x144xbf16>
    %cst = arith.constant dense<0.000000e+00> : vector<16x144xf32>
    %3 = tpu.matmul %1, %2, %cst {dimension_numbers = #tpu.dot_dimension_numbers<[1], [0], [0], [1], [0, 0, 1, 1], [], []>} : vector<16x48xbf16>, vector<48x144xbf16>, vector<16x144xf32> -> vector<16x144xf32>
    %c0_3 = arith.constant 0 : index
    %c0_4 = arith.constant 0 : index
    %4 = vector.load %arg3[%c0_3, %c0_4] : memref<1x144xf32, #tpu.memory_space<vmem>>, vector<1x144xf32>
    %5 = vector.broadcast %4 : vector<1x144xf32> to vector<16x144xf32>
    %6 = arith.addf %3, %5 : vector<16x144xf32>
    %7 = tpu.iota {dimensions = array<i32: 1>} : vector<16x144xi32>
    %c48_i32 = arith.constant 48 : i32
    %8 = vector.broadcast %c48_i32 : i32 to vector<16x144xi32>
    %9 = arith.cmpi slt, %7, %8 : vector<16x144xi32>
    %cst_5 = arith.constant 0.288675129 : f32
    %10 = vector.broadcast %cst_5 : f32 to vector<16x144xf32>
    %11 = arith.mulf %6, %10 : vector<16x144xf32>
    %12 = arith.select %9, %11, %6 : vector<16x144xi1>, vector<16x144xf32>
    %13 = arith.truncf %12 : vector<16x144xf32> to vector<16x144xbf16>
    %c0_6 = arith.constant 0 : index
    %c0_7 = arith.constant 0 : index
    %14 = vector.load %arg4[%c0_6, %c0_7] : memref<16x144xbf16, #tpu.memory_space<vmem>>, vector<16x144xbf16>
    tpu.vector_store %arg4[%c0_6, %c0_7], %13 {strides = array<i32>} : memref<16x144xbf16, #tpu.memory_space<vmem>>, vector<16x144xbf16>,
    return
  }
  func.func @transform_0(%arg0: i32) -> (i32, i32) {
    %c0_i32 = arith.constant 0 : i32
    %c0_i32_0 = arith.constant 0 : i32
    return %arg0, %c0_i32 : i32, i32
  }
  func.func @transform_1(%arg0: i32) -> (i32, i32) {
    %c0_i32 = arith.constant 0 : i32
    %c0_i32_0 = arith.constant 0 : i32
    %c0_i32_1 = arith.constant 0 : i32
    return %c0_i32, %c0_i32_0 : i32, i32
  }
  func.func @transform_2(%arg0: i32) -> (i32, i32) {
    %c0_i32 = arith.constant 0 : i32
    %c0_i32_0 = arith.constant 0 : i32
    %c0_i32_1 = arith.constant 0 : i32
    return %c0_i32, %c0_i32_0 : i32, i32
  }
  func.func @transform_3(%arg0: i32) -> (i32, i32) {
    %c0_i32 = arith.constant 0 : i32
    %c0_i32_0 = arith.constant 0 : i32
    return %arg0, %c0_i32 : i32, i32
  }
}

module attributes {stable_mosaic.version = 11 : i64} {
  func.func @_attn_proj_ln_kernel(%arg0: i32, %arg1: i32, %arg2: memref<1x8x144xbf16, #tpu.memory_space<vmem>>, %arg3: memref<1x8x144xbf16, #tpu.memory_space<vmem>>, %arg4: memref<1x1x8xf32, #tpu.memory_space<vmem>>, %arg5: memref<1x8x48xf32, #tpu.memory_space<vmem>>, %arg6: memref<48x48xbf16, #tpu.memory_space<vmem>>, %arg7: memref<1x48xf32, #tpu.memory_space<vmem>>, %arg8: memref<1x48xf32, #tpu.memory_space<vmem>>, %arg9: memref<1x48xf32, #tpu.memory_space<vmem>>, %arg10: memref<1x8x48xf32, #tpu.memory_space<vmem>>) attributes {dimension_semantics = [#tpu.dimension_semantics<parallel>, #tpu.dimension_semantics<parallel>], iteration_bounds = array<i64: 2, 1>, scalar_prefetch = 0 : i64, scratch_operands = 0 : i64, tpu.core_type = #tpu.core_type<tc>, window_params = [{transform_indices = @transform_0, window_bounds = array<i64: 1, 8, 144>}, {transform_indices = @transform_1, window_bounds = array<i64: 1, 8, 144>}, {transform_indices = @transform_2, window_bounds = array<i64: 1, 1, 8>}, {transform_indices = @transform_3, window_bounds = array<i64: 1, 8, 48>}, {pipeline_mode = #tpu.pipeline_mode<synchronous>, transform_indices = @transform_4, window_bounds = array<i64: 48, 48>}, {pipeline_mode = #tpu.pipeline_mode<synchronous>, transform_indices = @transform_5, window_bounds = array<i64: 1, 48>}, {pipeline_mode = #tpu.pipeline_mode<synchronous>, transform_indices = @transform_6, window_bounds = array<i64: 1, 48>}, {pipeline_mode = #tpu.pipeline_mode<synchronous>, transform_indices = @transform_7, window_bounds = array<i64: 1, 48>}, {transform_indices = @transform_8, window_bounds = array<i64: 1, 8, 48>}]} {
    %c0 = arith.constant 0 : index
    %c0_0 = arith.constant 0 : index
    %c0_1 = arith.constant 0 : index
    %0 = vector.load %arg4[%c0, %c0_0, %c0_1] : memref<1x1x8xf32, #tpu.memory_space<vmem>>, vector<1x1x8xf32>
    %1 = vector.shape_cast %0 : vector<1x1x8xf32> to vector<1x8xf32>
    %c0_2 = arith.constant 0 : index
    %c0_3 = arith.constant 0 : index
    %c0_4 = arith.constant 0 : index
    %2 = vector.load %arg2[%c0_2, %c0_3, %c0_4] : memref<1x8x144xbf16, #tpu.memory_space<vmem>>, vector<1x8x12xbf16>
    %3 = vector.shape_cast %2 : vector<1x8x12xbf16> to vector<8x12xbf16>
    %c0_5 = arith.constant 0 : index
    %c0_6 = arith.constant 0 : index
    %c48 = arith.constant 48 : index
    %4 = vector.load %arg3[%c0_5, %c0_6, %c48] : memref<1x8x144xbf16, #tpu.memory_space<vmem>>, vector<1x8x12xbf16>
    %5 = vector.shape_cast %4 : vector<1x8x12xbf16> to vector<8x12xbf16>
    %c0_7 = arith.constant 0 : index
    %c0_8 = arith.constant 0 : index
    %c96 = arith.constant 96 : index
    %6 = vector.load %arg3[%c0_7, %c0_8, %c96] : memref<1x8x144xbf16, #tpu.memory_space<vmem>>, vector<1x8x12xbf16>
    %7 = vector.shape_cast %6 : vector<1x8x12xbf16> to vector<8x12xbf16>
    %cst = arith.constant dense<0.000000e+00> : vector<8x8xf32>
    %8 = tpu.matmul %3, %5, %cst {dimension_numbers = #tpu.dot_dimension_numbers<[1], [1], [0], [0], [0, 0, 1, 0], [], []>} : vector<8x12xbf16>, vector<8x12xbf16>, vector<8x8xf32> -> vector<8x8xf32>
    %9 = vector.broadcast %1 : vector<1x8xf32> to vector<8x8xf32>
    %10 = arith.addf %8, %9 : vector<8x8xf32>
    %cst_9 = arith.constant dense<0xFF800000> : vector<8xf32>
    %11 = vector.multi_reduction <maximumf>, %10, %cst_9 [1] : vector<8x8xf32> to vector<8xf32>
    %12 = vector.shape_cast %11 : vector<8xf32> to vector<8x1xf32>
    %13 = vector.broadcast %12 : vector<8x1xf32> to vector<8x8xf32>
    %14 = arith.subf %10, %13 : vector<8x8xf32>
    %15 = math.exp %14 : vector<8x8xf32>
    %cst_10 = arith.constant dense<0.000000e+00> : vector<8xf32>
    %16 = vector.multi_reduction <add>, %15, %cst_10 [1] : vector<8x8xf32> to vector<8xf32>
    %17 = vector.shape_cast %16 : vector<8xf32> to vector<8x1xf32>
    %18 = tpu.reciprocal %17 {approx = true} : vector<8x1xf32> -> vector<8x1xf32>
    %19 = vector.broadcast %18 : vector<8x1xf32> to vector<8x8xf32>
    %20 = arith.mulf %15, %19 : vector<8x8xf32>
    %21 = arith.truncf %20 : vector<8x8xf32> to vector<8x8xbf16>
    %cst_11 = arith.constant dense<0.000000e+00> : vector<8x12xf32>
    %22 = tpu.matmul %21, %7, %cst_11 {dimension_numbers = #tpu.dot_dimension_numbers<[1], [0], [0], [1], [0, 0, 1, 1], [], []>} : vector<8x8xbf16>, vector<8x12xbf16>, vector<8x12xf32> -> vector<8x12xf32>
    %23 = arith.truncf %22 : vector<8x12xf32> to vector<8x12xbf16>
    %c0_12 = arith.constant 0 : index
    %c0_13 = arith.constant 0 : index
    %24 = vector.load %arg6[%c0_12, %c0_13] : memref<48x48xbf16, #tpu.memory_space<vmem>>, vector<12x48xbf16>
    %cst_14 = arith.constant dense<0.000000e+00> : vector<8x48xf32>
    %25 = tpu.matmul %23, %24, %cst_14 {dimension_numbers = #tpu.dot_dimension_numbers<[1], [0], [0], [1], [0, 0, 1, 1], [], []>} : vector<8x12xbf16>, vector<12x48xbf16>, vector<8x48xf32> -> vector<8x48xf32>
    %c0_15 = arith.constant 0 : index
    %c0_16 = arith.constant 0 : index
    %c12 = arith.constant 12 : index
    %26 = vector.load %arg2[%c0_15, %c0_16, %c12] : memref<1x8x144xbf16, #tpu.memory_space<vmem>>, vector<1x8x12xbf16>
    %27 = vector.shape_cast %26 : vector<1x8x12xbf16> to vector<8x12xbf16>
    %c0_17 = arith.constant 0 : index
    %c0_18 = arith.constant 0 : index
    %c60 = arith.constant 60 : index
    %28 = vector.load %arg3[%c0_17, %c0_18, %c60] : memref<1x8x144xbf16, #tpu.memory_space<vmem>>, vector<1x8x12xbf16>
    %29 = vector.shape_cast %28 : vector<1x8x12xbf16> to vector<8x12xbf16>
    %c0_19 = arith.constant 0 : index
    %c0_20 = arith.constant 0 : index
    %c108 = arith.constant 108 : index
    %30 = vector.load %arg3[%c0_19, %c0_20, %c108] : memref<1x8x144xbf16, #tpu.memory_space<vmem>>, vector<1x8x12xbf16>
    %31 = vector.shape_cast %30 : vector<1x8x12xbf16> to vector<8x12xbf16>
    %cst_21 = arith.constant dense<0.000000e+00> : vector<8x8xf32>
    %32 = tpu.matmul %27, %29, %cst_21 {dimension_numbers = #tpu.dot_dimension_numbers<[1], [1], [0], [0], [0, 0, 1, 0], [], []>} : vector<8x12xbf16>, vector<8x12xbf16>, vector<8x8xf32> -> vector<8x8xf32>
    %33 = vector.broadcast %1 : vector<1x8xf32> to vector<8x8xf32>
    %34 = arith.addf %32, %33 : vector<8x8xf32>
    %cst_22 = arith.constant dense<0xFF800000> : vector<8xf32>
    %35 = vector.multi_reduction <maximumf>, %34, %cst_22 [1] : vector<8x8xf32> to vector<8xf32>
    %36 = vector.shape_cast %35 : vector<8xf32> to vector<8x1xf32>
    %37 = vector.broadcast %36 : vector<8x1xf32> to vector<8x8xf32>
    %38 = arith.subf %34, %37 : vector<8x8xf32>
    %39 = math.exp %38 : vector<8x8xf32>
    %cst_23 = arith.constant dense<0.000000e+00> : vector<8xf32>
    %40 = vector.multi_reduction <add>, %39, %cst_23 [1] : vector<8x8xf32> to vector<8xf32>
    %41 = vector.shape_cast %40 : vector<8xf32> to vector<8x1xf32>
    %42 = tpu.reciprocal %41 {approx = true} : vector<8x1xf32> -> vector<8x1xf32>
    %43 = vector.broadcast %42 : vector<8x1xf32> to vector<8x8xf32>
    %44 = arith.mulf %39, %43 : vector<8x8xf32>
    %45 = arith.truncf %44 : vector<8x8xf32> to vector<8x8xbf16>
    %cst_24 = arith.constant dense<0.000000e+00> : vector<8x12xf32>
    %46 = tpu.matmul %45, %31, %cst_24 {dimension_numbers = #tpu.dot_dimension_numbers<[1], [0], [0], [1], [0, 0, 1, 1], [], []>} : vector<8x8xbf16>, vector<8x12xbf16>, vector<8x12xf32> -> vector<8x12xf32>
    %47 = arith.truncf %46 : vector<8x12xf32> to vector<8x12xbf16>
    %c12_25 = arith.constant 12 : index
    %c0_26 = arith.constant 0 : index
    %48 = vector.load %arg6[%c12_25, %c0_26] : memref<48x48xbf16, #tpu.memory_space<vmem>>, vector<12x48xbf16>
    %cst_27 = arith.constant dense<0.000000e+00> : vector<8x48xf32>
    %49 = tpu.matmul %47, %48, %cst_27 {dimension_numbers = #tpu.dot_dimension_numbers<[1], [0], [0], [1], [0, 0, 1, 1], [], []>} : vector<8x12xbf16>, vector<12x48xbf16>, vector<8x48xf32> -> vector<8x48xf32>
    %50 = arith.addf %25, %49 : vector<8x48xf32>
    %c0_28 = arith.constant 0 : index
    %c0_29 = arith.constant 0 : index
    %c24 = arith.constant 24 : index
    %51 = vector.load %arg2[%c0_28, %c0_29, %c24] : memref<1x8x144xbf16, #tpu.memory_space<vmem>>, vector<1x8x12xbf16>
    %52 = vector.shape_cast %51 : vector<1x8x12xbf16> to vector<8x12xbf16>
    %c0_30 = arith.constant 0 : index
    %c0_31 = arith.constant 0 : index
    %c72 = arith.constant 72 : index
    %53 = vector.load %arg3[%c0_30, %c0_31, %c72] : memref<1x8x144xbf16, #tpu.memory_space<vmem>>, vector<1x8x12xbf16>
    %54 = vector.shape_cast %53 : vector<1x8x12xbf16> to vector<8x12xbf16>
    %c0_32 = arith.constant 0 : index
    %c0_33 = arith.constant 0 : index
    %c120 = arith.constant 120 : index
    %55 = vector.load %arg3[%c0_32, %c0_33, %c120] : memref<1x8x144xbf16, #tpu.memory_space<vmem>>, vector<1x8x12xbf16>
    %56 = vector.shape_cast %55 : vector<1x8x12xbf16> to vector<8x12xbf16>
    %cst_34 = arith.constant dense<0.000000e+00> : vector<8x8xf32>
    %57 = tpu.matmul %52, %54, %cst_34 {dimension_numbers = #tpu.dot_dimension_numbers<[1], [1], [0], [0], [0, 0, 1, 0], [], []>} : vector<8x12xbf16>, vector<8x12xbf16>, vector<8x8xf32> -> vector<8x8xf32>
    %58 = vector.broadcast %1 : vector<1x8xf32> to vector<8x8xf32>
    %59 = arith.addf %57, %58 : vector<8x8xf32>
    %cst_35 = arith.constant dense<0xFF800000> : vector<8xf32>
    %60 = vector.multi_reduction <maximumf>, %59, %cst_35 [1] : vector<8x8xf32> to vector<8xf32>
    %61 = vector.shape_cast %60 : vector<8xf32> to vector<8x1xf32>
    %62 = vector.broadcast %61 : vector<8x1xf32> to vector<8x8xf32>
    %63 = arith.subf %59, %62 : vector<8x8xf32>
    %64 = math.exp %63 : vector<8x8xf32>
    %cst_36 = arith.constant dense<0.000000e+00> : vector<8xf32>
    %65 = vector.multi_reduction <add>, %64, %cst_36 [1] : vector<8x8xf32> to vector<8xf32>
    %66 = vector.shape_cast %65 : vector<8xf32> to vector<8x1xf32>
    %67 = tpu.reciprocal %66 {approx = true} : vector<8x1xf32> -> vector<8x1xf32>
    %68 = vector.broadcast %67 : vector<8x1xf32> to vector<8x8xf32>
    %69 = arith.mulf %64, %68 : vector<8x8xf32>
    %70 = arith.truncf %69 : vector<8x8xf32> to vector<8x8xbf16>
    %cst_37 = arith.constant dense<0.000000e+00> : vector<8x12xf32>
    %71 = tpu.matmul %70, %56, %cst_37 {dimension_numbers = #tpu.dot_dimension_numbers<[1], [0], [0], [1], [0, 0, 1, 1], [], []>} : vector<8x8xbf16>, vector<8x12xbf16>, vector<8x12xf32> -> vector<8x12xf32>
    %72 = arith.truncf %71 : vector<8x12xf32> to vector<8x12xbf16>
    %c24_38 = arith.constant 24 : index
    %c0_39 = arith.constant 0 : index
    %73 = vector.load %arg6[%c24_38, %c0_39] : memref<48x48xbf16, #tpu.memory_space<vmem>>, vector<12x48xbf16>
    %cst_40 = arith.constant dense<0.000000e+00> : vector<8x48xf32>
    %74 = tpu.matmul %72, %73, %cst_40 {dimension_numbers = #tpu.dot_dimension_numbers<[1], [0], [0], [1], [0, 0, 1, 1], [], []>} : vector<8x12xbf16>, vector<12x48xbf16>, vector<8x48xf32> -> vector<8x48xf32>
    %75 = arith.addf %50, %74 : vector<8x48xf32>
    %c0_41 = arith.constant 0 : index
    %c0_42 = arith.constant 0 : index
    %c36 = arith.constant 36 : index
    %76 = vector.load %arg2[%c0_41, %c0_42, %c36] : memref<1x8x144xbf16, #tpu.memory_space<vmem>>, vector<1x8x12xbf16>
    %77 = vector.shape_cast %76 : vector<1x8x12xbf16> to vector<8x12xbf16>
    %c0_43 = arith.constant 0 : index
    %c0_44 = arith.constant 0 : index
    %c84 = arith.constant 84 : index
    %78 = vector.load %arg3[%c0_43, %c0_44, %c84] : memref<1x8x144xbf16, #tpu.memory_space<vmem>>, vector<1x8x12xbf16>
    %79 = vector.shape_cast %78 : vector<1x8x12xbf16> to vector<8x12xbf16>
    %c0_45 = arith.constant 0 : index
    %c0_46 = arith.constant 0 : index
    %c132 = arith.constant 132 : index
    %80 = vector.load %arg3[%c0_45, %c0_46, %c132] : memref<1x8x144xbf16, #tpu.memory_space<vmem>>, vector<1x8x12xbf16>
    %81 = vector.shape_cast %80 : vector<1x8x12xbf16> to vector<8x12xbf16>
    %cst_47 = arith.constant dense<0.000000e+00> : vector<8x8xf32>
    %82 = tpu.matmul %77, %79, %cst_47 {dimension_numbers = #tpu.dot_dimension_numbers<[1], [1], [0], [0], [0, 0, 1, 0], [], []>} : vector<8x12xbf16>, vector<8x12xbf16>, vector<8x8xf32> -> vector<8x8xf32>
    %83 = vector.broadcast %1 : vector<1x8xf32> to vector<8x8xf32>
    %84 = arith.addf %82, %83 : vector<8x8xf32>
    %cst_48 = arith.constant dense<0xFF800000> : vector<8xf32>
    %85 = vector.multi_reduction <maximumf>, %84, %cst_48 [1] : vector<8x8xf32> to vector<8xf32>
    %86 = vector.shape_cast %85 : vector<8xf32> to vector<8x1xf32>
    %87 = vector.broadcast %86 : vector<8x1xf32> to vector<8x8xf32>
    %88 = arith.subf %84, %87 : vector<8x8xf32>
    %89 = math.exp %88 : vector<8x8xf32>
    %cst_49 = arith.constant dense<0.000000e+00> : vector<8xf32>
    %90 = vector.multi_reduction <add>, %89, %cst_49 [1] : vector<8x8xf32> to vector<8xf32>
    %91 = vector.shape_cast %90 : vector<8xf32> to vector<8x1xf32>
    %92 = tpu.reciprocal %91 {approx = true} : vector<8x1xf32> -> vector<8x1xf32>
    %93 = vector.broadcast %92 : vector<8x1xf32> to vector<8x8xf32>
    %94 = arith.mulf %89, %93 : vector<8x8xf32>
    %95 = arith.truncf %94 : vector<8x8xf32> to vector<8x8xbf16>
    %cst_50 = arith.constant dense<0.000000e+00> : vector<8x12xf32>
    %96 = tpu.matmul %95, %81, %cst_50 {dimension_numbers = #tpu.dot_dimension_numbers<[1], [0], [0], [1], [0, 0, 1, 1], [], []>} : vector<8x8xbf16>, vector<8x12xbf16>, vector<8x12xf32> -> vector<8x12xf32>
    %97 = arith.truncf %96 : vector<8x12xf32> to vector<8x12xbf16>
    %c36_51 = arith.constant 36 : index
    %c0_52 = arith.constant 0 : index
    %98 = vector.load %arg6[%c36_51, %c0_52] : memref<48x48xbf16, #tpu.memory_space<vmem>>, vector<12x48xbf16>
    %cst_53 = arith.constant dense<0.000000e+00> : vector<8x48xf32>
    %99 = tpu.matmul %97, %98, %cst_53 {dimension_numbers = #tpu.dot_dimension_numbers<[1], [0], [0], [1], [0, 0, 1, 1], [], []>} : vector<8x12xbf16>, vector<12x48xbf16>, vector<8x48xf32> -> vector<8x48xf32>
    %100 = arith.addf %75, %99 : vector<8x48xf32>
    %c0_54 = arith.constant 0 : index
    %c0_55 = arith.constant 0 : index
    %101 = vector.load %arg7[%c0_54, %c0_55] : memref<1x48xf32, #tpu.memory_space<vmem>>, vector<1x48xf32>
    %102 = vector.broadcast %101 : vector<1x48xf32> to vector<8x48xf32>
    %103 = arith.addf %100, %102 : vector<8x48xf32>
    %c0_56 = arith.constant 0 : index
    %c0_57 = arith.constant 0 : index
    %c0_58 = arith.constant 0 : index
    %104 = vector.load %arg5[%c0_56, %c0_57, %c0_58] : memref<1x8x48xf32, #tpu.memory_space<vmem>>, vector<1x8x48xf32>
    %105 = vector.shape_cast %104 : vector<1x8x48xf32> to vector<8x48xf32>
    %106 = arith.addf %103, %105 : vector<8x48xf32>
    %cst_59 = arith.constant dense<0.000000e+00> : vector<8xf32>
    %107 = vector.multi_reduction <add>, %106, %cst_59 [1] : vector<8x48xf32> to vector<8xf32>
    %108 = vector.shape_cast %107 : vector<8xf32> to vector<8x1xf32>
    %cst_60 = arith.constant 4.800000e+01 : f32
    %109 = vector.broadcast %cst_60 : f32 to vector<8x1xf32>
    %110 = arith.divf %108, %109 : vector<8x1xf32>
    %111 = vector.broadcast %110 : vector<8x1xf32> to vector<8x48xf32>
    %112 = arith.subf %106, %111 : vector<8x48xf32>
    %113 = arith.mulf %112, %112 : vector<8x48xf32>
    %cst_61 = arith.constant dense<0.000000e+00> : vector<8xf32>
    %114 = vector.multi_reduction <add>, %113, %cst_61 [1] : vector<8x48xf32> to vector<8xf32>
    %115 = vector.shape_cast %114 : vector<8xf32> to vector<8x1xf32>
    %cst_62 = arith.constant 4.800000e+01 : f32
    %116 = vector.broadcast %cst_62 : f32 to vector<8x1xf32>
    %117 = arith.divf %115, %116 : vector<8x1xf32>
    %118 = vector.broadcast %110 : vector<8x1xf32> to vector<8x48xf32>
    %119 = arith.subf %106, %118 : vector<8x48xf32>
    %cst_63 = arith.constant 9.99999974E-6 : f32
    %120 = vector.broadcast %cst_63 : f32 to vector<8x1xf32>
    %121 = arith.addf %117, %120 : vector<8x1xf32>
    %122 = math.rsqrt %121 : vector<8x1xf32>
    %123 = vector.broadcast %122 : vector<8x1xf32> to vector<8x48xf32>
    %124 = arith.mulf %119, %123 : vector<8x48xf32>
    %c0_64 = arith.constant 0 : index
    %c0_65 = arith.constant 0 : index
    %125 = vector.load %arg8[%c0_64, %c0_65] : memref<1x48xf32, #tpu.memory_space<vmem>>, vector<1x48xf32>
    %126 = vector.broadcast %125 : vector<1x48xf32> to vector<8x48xf32>
    %127 = arith.mulf %124, %126 : vector<8x48xf32>
    %c0_66 = arith.constant 0 : index
    %c0_67 = arith.constant 0 : index
    %128 = vector.load %arg9[%c0_66, %c0_67] : memref<1x48xf32, #tpu.memory_space<vmem>>, vector<1x48xf32>
    %129 = vector.broadcast %128 : vector<1x48xf32> to vector<8x48xf32>
    %130 = arith.addf %127, %129 : vector<8x48xf32>
    %c0_68 = arith.constant 0 : index
    %c0_69 = arith.constant 0 : index
    %c0_70 = arith.constant 0 : index
    %131 = vector.load %arg10[%c0_68, %c0_69, %c0_70] : memref<1x8x48xf32, #tpu.memory_space<vmem>>, vector<1x8x48xf32>
    %132 = vector.shape_cast %131 : vector<1x8x48xf32> to vector<8x48xf32>
    %133 = vector.shape_cast %130 : vector<8x48xf32> to vector<1x8x48xf32>
    tpu.vector_store %arg10[%c0_68, %c0_69, %c0_70], %133 {strides = array<i32>} : memref<1x8x48xf32, #tpu.memory_space<vmem>>, vector<1x8x48xf32>,
    return
  }
  func.func @transform_0(%arg0: i32, %arg1: i32) -> (i32, i32, i32) {
    %c0_i32 = arith.constant 0 : i32
    %c0_i32_0 = arith.constant 0 : i32
    return %arg0, %arg1, %c0_i32 : i32, i32, i32
  }
  func.func @transform_1(%arg0: i32, %arg1: i32) -> (i32, i32, i32) {
    %c0_i32 = arith.constant 0 : i32
    %c0_i32_0 = arith.constant 0 : i32
    %c0_i32_1 = arith.constant 0 : i32
    return %arg0, %c0_i32, %c0_i32_0 : i32, i32, i32
  }
  func.func @transform_2(%arg0: i32, %arg1: i32) -> (i32, i32, i32) {
    %c0_i32 = arith.constant 0 : i32
    %c0_i32_0 = arith.constant 0 : i32
    %c0_i32_1 = arith.constant 0 : i32
    return %arg0, %c0_i32, %c0_i32_0 : i32, i32, i32
  }
  func.func @transform_3(%arg0: i32, %arg1: i32) -> (i32, i32, i32) {
    %c0_i32 = arith.constant 0 : i32
    %c0_i32_0 = arith.constant 0 : i32
    return %arg0, %arg1, %c0_i32 : i32, i32, i32
  }
  func.func @transform_4(%arg0: i32, %arg1: i32) -> (i32, i32) {
    %c0_i32 = arith.constant 0 : i32
    %c0_i32_0 = arith.constant 0 : i32
    %c0_i32_1 = arith.constant 0 : i32
    return %c0_i32, %c0_i32_0 : i32, i32
  }
  func.func @transform_5(%arg0: i32, %arg1: i32) -> (i32, i32) {
    %c0_i32 = arith.constant 0 : i32
    %c0_i32_0 = arith.constant 0 : i32
    %c0_i32_1 = arith.constant 0 : i32
    return %c0_i32, %c0_i32_0 : i32, i32
  }
  func.func @transform_6(%arg0: i32, %arg1: i32) -> (i32, i32) {
    %c0_i32 = arith.constant 0 : i32
    %c0_i32_0 = arith.constant 0 : i32
    %c0_i32_1 = arith.constant 0 : i32
    return %c0_i32, %c0_i32_0 : i32, i32
  }
  func.func @transform_7(%arg0: i32, %arg1: i32) -> (i32, i32) {
    %c0_i32 = arith.constant 0 : i32
    %c0_i32_0 = arith.constant 0 : i32
    %c0_i32_1 = arith.constant 0 : i32
    return %c0_i32, %c0_i32_0 : i32, i32
  }
  func.func @transform_8(%arg0: i32, %arg1: i32) -> (i32, i32, i32) {
    %c0_i32 = arith.constant 0 : i32
    %c0_i32_0 = arith.constant 0 : i32
    return %arg0, %arg1, %c0_i32 : i32, i32, i32
  }
}

</mosaic_0001>

<bundles_post_ra>
// kernel: encoder_forward.6
= control target key start
LH: loop header
LB: loop body
LE: loop exit
PB: predicated region body
PF: predicated region fallthrough
CT: control target
= control target key end

     0   :  { %v168_v1 = vmov 0   ;;  %vm66_vm0 = vcmask 392192   ;;  %v26_v10 = vlaneseq  ;;  %vm138_vm2 = vcmask 1043456   ;;  %s222_s1 = inlined_call_operand.vmem [shape: bf16[48,144], index: 1, kind: input, shape index: {}]   ;;  %s223_s0 = inlined_call_operand.vmem [shape: f32[16,48], index: 0, kind: input, shape index: {}]   ;;  %s224_s2 = inlined_call_operand.vmem [shape: f32[1,144], index: 2, kind: input, shape index: {}]   ;;  %s225_s3 = inlined_call_operand.vmem [shape: bf16[16,144], index: 3, kind: output, shape index: {}]  }
   0x1   :  { %v159_v0 = vld [vmem:[%s222_s1 + $0x24] ss:$8 sps:$4 sm:$0xff]   ;;  %102 = vmatprep.mubr.bf16.mxu0 %v168_v1  ;;  %v161_v2 = vld [vmem:[%s222_s1 + $0x20] ss:$8 sps:$4 sm:$0xff]   ;;  %v162_v3 = vld [vmem:[%s222_s1 + $0x14] ss:$8 sps:$4 sm:$0xff]  }
   0x2   :  { %80 = vmatprep.subr.bf16.mxu0 %v159_v0  ;;  %v164_v4 = vld [vmem:[%s222_s1 + $0x10] ss:$8 sps:$4 sm:$0xff]   ;;  %v165_v5 = vld [vmem:[%s222_s1 + $0x4] ss:$8 sps:$4 sm:$0xff]   ;;  %v167_v6 = vld [vmem:[%s222_s1] ss:$8 sps:$4 sm:$0xff]  }
   0x3   :  { %81 = vmatpush1.bf16.msra.mxu0 %v161_v2  ;;  %v15_v7 = vld [vmem:[%s223_s0] sm:$0xff]  ;;  %v16_v8 = vld [vmem:[%s223_s0 + $0x8] sm:$0xff]  ;;  %v27_v11 = vshrl.u32 %v26_v10, 7  ;;  %v114_v16 = vand.u32 127, %v26_v10  ;;  %vm139_vm3 = vcmask 130052  }
   0x4   :  { %82 = vmatprep.subr.bf16.mxu0 %v162_v3  ;;  %v17_v9 = vpack.c.bf16 %v16_v8, %v15_v7  ;;  %v24_v13 = vld [vmem:[%s224_s2] sm:$0x3]  ;;  %vm140_vm4 = vmor %vm139_vm3, %vm138_vm2 }
   0x5   :  { %v28_v12 = vsub.s32 0, %v27_v11  ;;  %v32_v14 = vsub.s32 1, %v27_v11  ;;  %vm116_vm1 = vcmp.lt.s32.totalorder %v114_v16, 48 }
   0x7   :  { %83 = vmatpush1.bf16.msra.mxu0 %v164_v4  ;;  %v29_v15 = vrot.slane %v24_v13, %v28_v12  ;;  %v33_v17 = vrot.slane %v24_v13, %v32_v14 }
   0x8   :  { %84 = vmatprep.subr.bf16.mxu0 %v165_v5 }
   0xb   :  { %85 = vmatpush1.bf16.msra.mxu0 %v167_v6 }
   0xe   :  { %153 = vmatmul.mubr.msk.bf16.vlgmr.msra.gmra.mxu0 %vm66_vm0, %v17_v9 }
  0xce   :  { %v104_v18 = vpop.f32.mrf.mxu0 }
  0xcf   :  { %v105_v19 = vadd.f32 %v104_v18, %v29_v15 }
  0xd0   :  { %v106_v20 = vpop.f32.mrf.mxu0 }
  0xd1   :  { %v118_v21 = vmul.f32 0.28867513, %v105_v19  ;;  %v107_v22 = vadd.f32 %v106_v20, %v33_v17 }
  0xd2   :  { %v108_v23 = vpop.f32.mrf.mxu0 }
  0xd3   :  { %v122_v24 = vsel %vm116_vm1, %v118_v21, %v105_v19  ;;  %v109_v25 = vadd.f32 %v108_v23, %v29_v15 }
  0xd4   :  { %v156_v26 = vpack.c.bf16 %v107_v22, %v122_v24  ;;  %v110_v27 = vpop.f32.mrf.mxu0 }
  0xd5   :  { %v120_v28 = vmul.f32 0.28867513, %v109_v25  ;;  %v111_v29 = vadd.f32 %v110_v27, %v33_v17 }
  0xd6   :  { %141 = vst.msk [vmem:[%s225_s3] sm:$0xff] %vm140_vm4, %v156_v26 }
  0xd7   :  { %v124_v30 = vsel %vm116_vm1, %v120_v28, %v109_v25 }
  0xd8   :  { %v157_v31 = vpack.c.bf16 %v111_v29, %v124_v30 }
  0xda   :  { %142 = vst.msk [vmem:[%s225_s3 + $0x8] sm:$0xff] %vm140_vm4, %v157_v31 }

// kernel: encoder_forward.8
= control target key start
LH: loop header
LB: loop body
LE: loop exit
PB: predicated region body
PF: predicated region fallthrough
CT: control target
= control target key end

     0   :  { %vm31_vm0 = vcmask 392192   ;;  %v349_v0 = vmov 0.0   ;;  %vm350_vm1 = vmmov 0   ;;  %vm166_vm2 = vcmask 785408   ;;  %s453_s1 = inlined_call_operand.vmem [shape: bf16[48,96], index: 1, kind: input, shape index: {}]   ;;  %s454_s3 = inlined_call_operand.vmem [shape: bf16[96,48], index: 3, kind: input, shape index: {}]   ;;  %s455_s0 = inlined_call_operand.vmem [shape: f32[16,48], index: 0, kind: input, shape index: {}, may-alias: {0,7}]   ;;  %s456_s2 = inlined_call_operand.vmem [shape: f32[1,96], index: 2, kind: input, shape index: {}]   ;;  %s457_s4 = inlined_call_operand.vmem [shape: f32[1,48], index: 4, kind: input, shape index: {}]   ;;  %s458_s5 = inlined_call_operand.vmem [shape: f32[1,48], index: 5, kind: input, shape index: {}]   ;;  %s459_s6 = inlined_call_operand.vmem [shape: f32[1,48], index: 6, kind: input, shape index: {}]   ;;  %s460_s7 = inlined_call_operand.vmem [shape: f32[16,48], index: 7, kind: output, shape index: {}, may-alias: {0,7}]  }
   0x1   :  { %308 = vmatprep.subr.bf16.mxu0 %v349_v0  ;;  %v336_v1 = vld [vmem:[%s453_s1 + $0x10] sm:$0xff]   ;;  %314 = vmatprep.mubr.msk.bf16.mxu0 %vm350_vm1, %v349_v0  ;;  %32 = vst.msk [vmem:[#allocation2] sm:$0xff] %vm31_vm0, %v349_v0  ;;  %33 = vst.msk [vmem:[#allocation2 + $0x8] sm:$0xff] %vm31_vm0, %v349_v0  ;;  %v337_v2 = vld [vmem:[%s453_s1 + $0x8] sm:$0xff]  }
   0x2   :  { %318 = vmatprep.subr.bf16.mxu1 %v349_v0  ;;  %330 = vmatprep.mubr.msk.bf16.mxu1 %vm350_vm1, %v349_v0  ;;  %v338_v3 = vld [vmem:[%s453_s1] sm:$0xff]   ;;  %v339_v4 = vld [vmem:[%s454_s3 + $0x28] sm:$0xff]   ;;  %v341_v9 = vld [vmem:[%s454_s3 + $0x18] sm:$0xff]  }
   0x3   :  { %309 = vmatpush3.bf16.msra.mxu0 %v336_v1  ;;  %v34_v5 = vld [vmem:[%s455_s0] sm:$0xff]  ;;  %v35_v6 = vld [vmem:[%s455_s0 + $0x8] sm:$0xff]  ;;  %319 = vmatpush3.bf16.msra.mxu1 %v339_v4  ;;  %v342_v10 = vld [vmem:[%s454_s3 + $0x10] sm:$0xff]  }
   0x4   :  { %310 = vmatprep.subr.bf16.mxu0 %v349_v0  ;;  %v340_v7 = vld [vmem:[%s454_s3 + $0x20] sm:$0xff]   ;;  %320 = vmatprep.subr.bf16.mxu1 %v349_v0  ;;  %v36_v8 = vpack.c.bf16 %v35_v6, %v34_v5  ;;  %v343_v11 = vld [vmem:[%s454_s3 + $0x8] sm:$0xff]  }
   0x5   :  { %v344_v12 = vld [vmem:[%s454_s3] sm:$0xff]  }
   0x6   :  { %v282_v13 = vld [vmem:[%s456_s2] ss:$0 sm:$0xff] }
   0x7   :  { %311 = vmatpush3.bf16.msra.mxu0 %v337_v2  ;;  %321 = vmatpush3.bf16.msra.mxu1 %v340_v7  ;;  %v294_v31 = vld [vmem:[%s457_s4] ss:$0 sm:$0xff] }
   0x8   :  { %312 = vmatprep.subr.bf16.mxu0 %v349_v0  ;;  %322 = vmatprep.subr.bf16.mxu1 %v349_v0  ;;  %v115_v23 = vld [vmem:[#allocation2] sm:$0xff]  ;;  %v116_v27 = vld [vmem:[#allocation2 + $0x8] sm:$0xff] }
   0x9   :  { %v295_v57 = vld [vmem:[%s458_s5] ss:$0 sm:$0xff] }
   0xa   :  { %v296_v59 = vld [vmem:[%s459_s6] ss:$0 sm:$0xff] }
   0xb   :  { %313 = vmatpush3.bf16.msra.mxu0 %v338_v3  ;;  %323 = vmatpush3.bf16.msra.mxu1 %v341_v9 }
   0xc   :  { %324 = vmatprep.subr.bf16.mxu1 %v349_v0 }
   0xe   :  { %315 = vmatmul.mubr.msk.bf16.vlgmr.msra.gmra.mxu0 %vm31_vm0, %v36_v8 }
   0xf   :  { %325 = vmatpush3.bf16.msra.mxu1 %v342_v10 }
  0x10   :  { %326 = vmatprep.subr.bf16.mxu1 %v349_v0 }
  0x13   :  { %327 = vmatpush3.bf16.msra.mxu1 %v343_v11 }
  0x14   :  { %328 = vmatprep.subr.bf16.mxu1 %v349_v0 }
  0x17   :  { %329 = vmatpush3.bf16.msra.mxu1 %v344_v12 }
  0xce   :  { %v106_v14 = vpop.f32.mrf.mxu0 }
  0xcf   :  { %v107_v16 = vadd.f32 %v282_v13, %v106_v14 }
  0xd0   :  { %v316_v15 = vpop.f32.mrf.mxu0 }
  0xd1   :  { %v113_v20 = vmax.f32 %v107_v16, 0.0 }
  0xd2   :  { %v109_v17 = vpop.f32.mrf.mxu0 }
  0xd3   :  { %v110_v18 = vadd.f32 %v282_v13, %v109_v17 }
  0xd4   :  { %v317_v19 = vpop.f32.mrf.mxu0 }
  0xd5   :  { %v114_v21 = vmax.f32 %v110_v18, 0.0 }
  0xd7   :  { %v117_v22 = vpack.c.bf16 %v114_v21, %v113_v20 }
  0xd9   :  { %331 = vmatmul.mubr.msk.bf16.vlgmr.msra.gmra.mxu1 %vm166_vm2, %v117_v22 }
 0x199   :  { %v204_v24 = vpop.f32.mrf.mxu1 }
 0x19a   :  { %v211_v25 = vadd.f32 %v204_v24, %v115_v23 }
 0x19b   :  { %v332_v26 = vpop.f32.mrf.mxu1 }
 0x19c   :  { %213 = vst.msk [vmem:[#allocation2] sm:$0xff] %vm31_vm0, %v211_v25 }
 0x19d   :  { %v207_v28 = vpop.f32.mrf.mxu1 }
 0x19e   :  { %v212_v29 = vadd.f32 %v207_v28, %v116_v27 }
 0x19f   :  { %v333_v30 = vpop.f32.mrf.mxu1 }
 0x1a0   :  { %214 = vst.msk [vmem:[#allocation2 + $0x8] sm:$0xff] %vm31_vm0, %v212_v29 }
 0x1a3   :  { %v218_v32 = vld [vmem:[#allocation2] sm:$0xff] }
 0x1a4   :  { %v227_v33 = vadd.f32 %v294_v31, %v218_v32 }
 0x1a6   :  { %v229_v34 = vadd.f32 %v227_v33, %v34_v5 }
 0x1a7   :  { %v219_v35 = vld [vmem:[#allocation2 + $0x8] sm:$0xff] }
 0x1a8   :  { %v231_v36 = vsel %vm31_vm0, %v229_v34, 0.0  ;;  %v228_v37 = vadd.f32 %v294_v31, %v219_v35 }
 0x1a9   :  { %232 = vadd.xlane.f32.xlu0 %v231_v36 }
 0x1aa   :  { %v230_v38 = vadd.f32 %v228_v37, %v35_v6 }
 0x1ac   :  { %v234_v39 = vsel %vm31_vm0, %v230_v38, 0.0 }
 0x1ad   :  { %235 = vadd.xlane.f32.xlu0 %v234_v39 }
 0x232   :  { %v233_v40 = vpop.xlane.xlu0 %232 }
 0x233   :  { %v238_v41 = vmul.f32 0.020833334, %v233_v40 }
 0x235   :  { %v240_v42 = vsub.f32 %v229_v34, %v238_v41 }
 0x236   :  { %v236_v43 = vpop.xlane.xlu0 %235 }
 0x237   :  { %v239_v44 = vmul.f32 0.020833334, %v236_v43  ;;  %v242_v45 = vmul.f32 %v240_v42, %v240_v42 }
 0x239   :  { %v241_v46 = vsub.f32 %v230_v38, %v239_v44  ;;  %v244_v47 = vsel %vm31_vm0, %v242_v45, 0.0 }
 0x23a   :  { %245 = vadd.xlane.f32.xlu1 %v244_v47 }
 0x23b   :  { %v243_v48 = vmul.f32 %v241_v46, %v241_v46 }
 0x23d   :  { %v247_v49 = vsel %vm31_vm0, %v243_v48, 0.0 }
 0x23e   :  { %248 = vadd.xlane.f32.xlu1 %v247_v49 }
 0x2c3   :  { %v246_v50 = vpop.xlane.xlu1 %245 }
 0x2c4   :  { %v250_v51 = vmul.f32 0.020833334, %v246_v50 }
 0x2c6   :  { %v252_v52 = vadd.f32 1e-05, %v250_v51 }
 0x2c7   :  { %v249_v53 = vpop.xlane.xlu1 %248 }
 0x2c8   :  { %345 = vrsqrt.f32 %v252_v52  ;;  %v251_v54 = vmul.f32 0.020833334, %v249_v53 }
 0x2ca   :  { %v253_v55 = vadd.f32 1e-05, %v251_v54 }
 0x2cc   :  { %347 = vrsqrt.f32 %v253_v55 }
 0x2d5   :  { %v346_v56 = vpop.eup %345 }
 0x2d6   :  { %v256_v58 = vmul.f32 %v346_v56, %v240_v42 }
 0x2d8   :  { %v265_v60 = vmul.f32 %v295_v57, %v256_v58 }
 0x2d9   :  { %v348_v61 = vpop.eup %347 }
 0x2da   :  { %v274_v62 = vadd.f32 %v296_v59, %v265_v60  ;;  %v257_v63 = vmul.f32 %v348_v61, %v241_v46 }
 0x2dc   :  { %276 = vst.msk [vmem:[%s460_s7] sm:$0xff] %vm31_vm0, %v274_v62  ;;  %v266_v0 = vmul.f32 %v295_v57, %v257_v63 }
 0x2de   :  { %v275_v1 = vadd.f32 %v296_v59, %v266_v0 }
 0x2e0   :  { %277 = vst.msk [vmem:[%s460_s7 + $0x8] sm:$0xff] %vm31_vm0, %v275_v1 }

// kernel: encoder_forward.7
= control target key start
LH: loop header
LB: loop body
LE: loop exit
PB: predicated region body
PF: predicated region fallthrough
CT: control target
= control target key end

     0   :  { %s1532_s27 = smov 0   ;;  %s1534_s28 = smov 0   ;;  %s1703_s0 = inlined_call_operand.vmem [shape: bf16[2,8,144], index: 0, kind: input, shape index: {}, may-alias: {0,1}]   ;;  %s1704_s1 = inlined_call_operand.vmem [shape: bf16[2,8,144], index: 1, kind: input, shape index: {}, may-alias: {0,1}]   ;;  %s1705_s2 = inlined_call_operand.vmem [shape: f32[2,1,8], index: 2, kind: input, shape index: {}]   ;;  %s1706_s3 = inlined_call_operand.vmem [shape: f32[2,8,48], index: 3, kind: input, shape index: {}, may-alias: {3,8}]   ;;  %s1707_s4 = inlined_call_operand.vmem [shape: bf16[48,48], index: 4, kind: input, shape index: {}]   ;;  %s1708_s5 = inlined_call_operand.vmem [shape: f32[1,48], index: 5, kind: input, shape index: {}]   ;;  %s1709_s6 = inlined_call_operand.vmem [shape: f32[1,48], index: 6, kind: input, shape index: {}]   ;;  %s1710_s7 = inlined_call_operand.vmem [shape: f32[1,48], index: 7, kind: input, shape index: {}]   ;;  %s1711_s8 = inlined_call_operand.vmem [shape: f32[2,8,48], index: 8, kind: output, shape index: {}, may-alias: {3,8}]  }
   0x1   :  { %s1536_s29 = smov 0  }
   0x2 LB: > { %s30_s30 = sadd.s32 1, %s1468_s28  ;;  %p1254_p0 = scmp.ge.s32.totalorder %s1472_s29, 1  ;;  %s1472_s29 = sphi %s1536_s29, %s18_s29   ;;  %s1468_s28 = sphi %s1534_s28, %s1713_s28   ;;  %s1464_s27 = sphi %s1532_s27, %s1712_s27  }
   0x3   : > { %p32_p1 = scmp.ge.s32.totalorder %s30_s30, 2  ;;  %p314_p2 = scmp.lt.s32.totalorder %s1472_s29, 3 }
   0x5   : > { %s1715_s30 = smov (%p32_p1, %s30_s30), 0  ;;  %p315_p3 = pnand %p1254_p0, %p314_p2 }
   0x6   : > { %p369_p4 = scmp.lt.s32.totalorder (!%p315_p3), %s1464_s27, 1  ;;  %s1476_s13 = smov (!%p315_p3), 80  }
   0x7   : > { %318 = sbr.rel (%p315_p3) target bundleno = 3097 (0xc19), region = 52  ;;  %s1477_s17 = smov (!%p315_p3), 32  }
   0x8   : > { %s1478_s21 = smov (!%p315_p3), 68   ;;  %s1479_s22 = smov (!%p315_p3), 116  }
   0x9   : > { %s1480_s23 = smov (!%p315_p3), 20   ;;  %s1481_s26 = smov (!%p315_p3), 56  }
   0xa   : > { %s1484_s14 = smov (!%p315_p3), 44   ;;  %s1485_s15 = smov (!%p315_p3), 92  }
   0xb   : > { %s1486_s18 = smov (!%p315_p3), 124  }
   0xc   : > { %v1474_v0 = vmov 0.0   ;;  %vm1475_vm0 = vmmov 0   ;;  %s1717_s27 = smov (!%p369_p4, %s1464_s27), 1  ;;  %vm415_vm1 = vcmask 97280   ;;  %vm462_vm2 = vcmask 64512  }
   0xd   : > { %1314 = vmatprep.subr.bf16.mxu0 %v1474_v0  ;;  %1316 = vmatprep.mubr.msk.bf16.mxu0 %vm1475_vm0, %v1474_v0  ;;  %s1556_s9 = sshll.u32 %s1717_s27, 3  ;;  %s385_s20 = scalar_lea.vmem %s1705_s2, %s1717_s27  ;;  %vm480_vm3 = vcmask 1043456   ;;  %v1426_v42 = vld [vmem:[%s1707_s4 + $0x4] sm:$0xfc]   ;;  %vm652_vm4 = vcmask 1045504   ;;  %vm1102_vm5 = vcmask 392192  }
   0xe   : > { %1320 = vmatprep.subr.bf16.mxu1 %v1474_v0  ;;  %1322 = vmatprep.mubr.msk.bf16.mxu1 %vm1475_vm0, %v1474_v0  ;;  %s1562_s12 = scalar_lea.vmem %s1704_s1, %s1556_s9  ;;  %s377_s16 = scalar_lea.vmem %s1703_s0, %s1556_s9  ;;  %v1581_v5 = vld [vmem:[%s385_s20] ss:$0 sm:$0xff]  ;;  %v648_v43 = vrot.slane %v1426_v42, 2 }
   0xf   : > { %v1565_v1 = vld [vmem:[%s1562_s12] ss:$0 sps:$4 sm:$0xff]   ;;  %s1482_s27 = smov 104  }
  0x10   : > { %413 = vrot.lane.b32.xlu0 %v1565_v1, %s1476_s13  ;;  %v402_v4 = vld [vmem:[%s377_s16] sm:$0xf]  ;;  %475 = vrot.lane.b32.xlu1 %v1565_v1, %s1477_s17  ;;  %v654_v44 = vsel %vm652_vm4, %v648_v43, 0  ;;  %s1483_s13 = smov 8  }
  0x11   : > { %v1589_v19 = vcombine.low %v402_v4, %v402_v4  ;;  %v1425_v48 = vld [vmem:[%s1707_s4] sm:$0x3f]  }
  0x12   : > { %v705_v52 = vsel %vm652_vm4, %v1425_v48, 0 }
  0x82   : > { %v414_v2 = vpop.permute.xlu0 %413  ;;  %v476_v12 = vpop.permute.xlu1 %475 }
  0x83   : > { %v420_v3 = vsel %vm415_vm1, %v414_v2, 0  ;;  %v482_v13 = vsel %vm480_vm3, %v476_v12, 0 }
  0x84   : > { %1315 = vmatpush3.bf16.xpose.msra.mxu0 %v420_v3  ;;  %1321 = vmatpush3.bf16.msra.mxu1 %v482_v13 }
  0x85   : > { %1332 = vmatprep.subr.bf16.mxu0 %v1474_v0  ;;  %1326 = vmatprep.subr.bf16.mxu1 %v1474_v0 }
  0x8b   : > { %1317 = vmatmul.mubr.msk.bf16.vlgmr.msra.gmra.mxu0 %vm415_vm1, %v402_v4 }
  0x8c   : > { %1334 = vmatprep.mubr.msk.bf16.mxu0 %vm1475_vm0, %v1474_v0 }
 0x14b   : > { %v456_v6 = vpop.f32.mrf.mxu0 }
 0x14c   : > { %v457_v7 = vadd.f32 %v1581_v5, %v456_v6 }
 0x14d   : > { %v1318_v8 = vpop.f32.mrf.mxu0 }
 0x14e   : > { %v463_v9 = vsel %vm462_vm2, %v457_v7, -inf }
 0x14f   : > { %464 = vmax.xlane.f32.xlu0 %v463_v9  ;;  %v459_v10 = vpop.f32.mrf.mxu0 }
 0x151   : > { %v1319_v11 = vpop.f32.mrf.mxu0 }
 0x1d8   : > { %v465_v14 = vpop.xlane.xlu0 %464 }
 0x1d9   : > { %v466_v15 = vsub.f32 %v457_v7, %v465_v14 }
 0x1db   : > { %v467_v16 = vmul.f32 1.442695, %v466_v15  ;;  %v747_v15 = vld [vmem:[%s1562_s12] sm:$0xff] }
 0x1dd   : > { %1432 = vpow2.f32 %v467_v16  ;;  %v1273_v16 = vcombine.low %v747_v15, %v747_v15 }
 0x1ea   : > { %v1433_v17 = vpop.eup %1432 }
 0x1eb   : > { %v469_v18 = vsel %vm462_vm2, %v1433_v17, 0.0 }
 0x1ec   : > { %470 = vadd.xlane.f32.xlu1 %v469_v18 }
 0x1fd   : > { %532 = vrot.lane.b32.xlu1 %v1565_v1, %s1478_s21 }
 0x201   : > { %530 = vrot.lane.b32.xlu1 %v1589_v19, %s1479_s22  ;;  %s392_s22 = scalar_lea.vmem %s1706_s3, %s1556_s9 }
 0x275   : > { %v471_v20 = vpop.xlane.xlu1 %470 }
 0x276   : > { %1434 = vrcp.f32 %v471_v20 }
 0x279   : > { %v533_v22 = vpop.permute.xlu1 %532 }
 0x27a   : > { %v538_v24 = vsel %vm415_vm1, %v533_v22, 0 }
 0x27d   : > { %v531_v26 = vpop.permute.xlu1 %530 }
 0x283   : > { %v1435_v21 = vpop.eup %1434 }
 0x284   : > { %v473_v23 = vmul.f32 %v1435_v21, %v1433_v17  ;;  %v1274_v17 = vcombine.high %v747_v15, %v747_v15 }
 0x286   : > { %v474_v25 = vpack.c.bf16 %v473_v23, %v473_v23 }
 0x288   : > { %1323 = vmatmul.mubr.msk.bf16.vlgmr.msra.gmra.mxu1 %vm462_vm2, %v474_v25 }
 0x289   : > { %1327 = vmatpush3.bf16.xpose.msra.mxu1 %v538_v24  ;;  %1328 = vmatprep.mubr.msk.bf16.mxu1 %vm1475_vm0, %v1474_v0 }
 0x28a   : > { %1338 = vmatprep.subr.bf16.mxu1 %v1474_v0 }
 0x290   : > { %1329 = vmatmul.mubr.msk.bf16.vlgmr.msra.gmra.mxu1 %vm415_vm1, %v531_v26 }
 0x291   : > { %1340 = vmatprep.mubr.msk.bf16.mxu1 %vm1475_vm0, %v1474_v0  ;;  %1339 = vmatpush3.bf16.msra.mxu1 %v654_v44 }
 0x292   : > { %1350 = vmatprep.subr.bf16.mxu1 %v1474_v0 }
 0x348   : > { %v518_v27 = vpop.f32.mrf.mxu1 }
 0x349   : > { %v524_v53 = vpack.c.bf16 %v518_v27, %v518_v27 }
 0x34a   : > { %v1324_v28 = vpop.f32.mrf.mxu1 }
 0x34c   : > { %v521_v29 = vpop.f32.mrf.mxu1 }
 0x34e   : > { %v1325_v30 = vpop.f32.mrf.mxu1 }
 0x350   : > { %v574_v31 = vpop.f32.mrf.mxu1 }
 0x351   : > { %v575_v32 = vadd.f32 %v1581_v5, %v574_v31 }
 0x352   : > { %v1330_v33 = vpop.f32.mrf.mxu1 }
 0x353   : > { %v580_v34 = vsel %vm462_vm2, %v575_v32, -inf  ;;  %v1429_v33 = vld [vmem:[%s1707_s4 + $0xc] sm:$0x3f]  }
 0x354   : > { %581 = vmax.xlane.f32.xlu1 %v580_v34  ;;  %v577_v35 = vpop.f32.mrf.mxu1  ;;  %v879_v34 = vsel %vm652_vm4, %v1429_v33, 0 }
 0x356   : > { %v1331_v36 = vpop.f32.mrf.mxu1 }
 0x3dd   : > { %v582_v37 = vpop.xlane.xlu1 %581 }
 0x3de   : > { %v583_v38 = vsub.f32 %v575_v32, %v582_v37 }
 0x3e0   : > { %v584_v39 = vmul.f32 1.442695, %v583_v38 }
 0x3e2   : > { %1436 = vpow2.f32 %v584_v39 }
 0x3ef   : > { %v1437_v40 = vpop.eup %1436 }
 0x3f0   : > { %v586_v41 = vsel %vm462_vm2, %v1437_v40, 0.0 }
 0x3f1   : > { %587 = vadd.xlane.f32.xlu0 %v586_v41 }
 0x407   : > { %592 = vrot.lane.b32.xlu0 %v1565_v1, %s1480_s23 }
 0x40b   : > { %750 = vrot.lane.b32.xlu0 %v1565_v1, %s1481_s26 }
 0x40f   : > { %748 = vrot.lane.b32.xlu0 %v1589_v19, %s1482_s27 }
 0x47a   : > { %v588_v45 = vpop.xlane.xlu0 %587 }
 0x47b   : > { %1438 = vrcp.f32 %v588_v45 }
 0x47e   : > { %v593_v46 = vpop.permute.xlu0 %592 }
 0x47f   : > { %v598_v47 = vsel %vm480_vm3, %v593_v46, 0 }
 0x480   : > { %1333 = vmatpush3.bf16.msra.mxu0 %v598_v47 }
 0x481   : > { %1344 = vmatprep.subr.bf16.mxu0 %v1474_v0 }
 0x482   : > { %v751_v54 = vpop.permute.xlu0 %750 }
 0x483   : > { %v756_v57 = vsel %vm415_vm1, %v751_v54, 0  ;;  %v1431_v54 = vld [vmem:[%s1707_s4 + $0x10] sm:$0xfc]  }
 0x486   : > { %v749_v62 = vpop.permute.xlu0 %748 }
 0x488   : > { %v1439_v49 = vpop.eup %1438 }
 0x489   : > { %v590_v50 = vmul.f32 %v1439_v49, %v1437_v40 }
 0x48b   : > { %v591_v51 = vpack.c.bf16 %v590_v50, %v590_v50 }
 0x48d   : > { %1335 = vmatmul.mubr.msk.bf16.vlgmr.msra.gmra.mxu0 %vm462_vm2, %v591_v51 }
 0x48e   : > { %1345 = vmatpush3.bf16.msra.mxu0 %v705_v52  ;;  %1346 = vmatprep.mubr.msk.bf16.mxu0 %vm1475_vm0, %v1474_v0 }
 0x48f   : > { %1356 = vmatprep.subr.bf16.mxu0 %v1474_v0 }
 0x495   : > { %1347 = vmatmul.mubr.msk.bf16.vlgmr.msra.gmra.mxu0 %vm415_vm1, %v524_v53 }
 0x496   : > { %1358 = vmatprep.mubr.msk.bf16.mxu0 %vm1475_vm0, %v1474_v0 }
 0x54d   : > { %v634_v55 = vpop.f32.mrf.mxu0 }
 0x54e   : > { %v640_v56 = vpack.c.bf16 %v634_v55, %v634_v55 }
 0x54f   : > { %v1336_v58 = vpop.f32.mrf.mxu0 }
 0x550   : > { %1341 = vmatmul.mubr.msk.bf16.vlgmr.msra.gmra.mxu1 %vm415_vm1, %v640_v56  ;;  %v1044_v56 = vrot.slane %v1431_v54, 2 }
 0x551   : > { %1351 = vmatpush3.bf16.xpose.msra.mxu1 %v756_v57  ;;  %v637_v59 = vpop.f32.mrf.mxu0  ;;  %1352 = vmatprep.mubr.msk.bf16.mxu1 %vm1475_vm0, %v1474_v0 }
 0x552   : > { %1362 = vmatprep.subr.bf16.mxu1 %v1474_v0  ;;  %v1049_v58 = vsel %vm652_vm4, %v1044_v56, 0 }
 0x553   : > { %v1337_v60 = vpop.f32.mrf.mxu0 }
 0x555   : > { %v1629_v61 = vpop.f32.mrf.mxu0 }
 0x557   : > { %v1348_v63 = vpop.f32.mrf.mxu0 }
 0x558   : > { %1353 = vmatmul.mubr.msk.bf16.vlgmr.msra.gmra.mxu1 %vm415_vm1, %v749_v62 }
 0x559   : > { %v744_v2 = vpop.f32.mrf.mxu0  ;;  %1364 = vmatprep.mubr.msk.bf16.mxu1 %vm1475_vm0, %v1474_v0  ;;  %1363 = vmatpush3.bf16.msra.mxu1 %v879_v34 }
 0x55a   : > { %1374 = vmatprep.subr.bf16.mxu1 %v1474_v0 }
 0x55b   : > { %v1349_v3 = vpop.f32.mrf.mxu0 }
 0x610   : > { %v1634_v4 = vpop.f32.mrf.mxu1 }
 0x612   : > { %v1342_v6 = vpop.f32.mrf.mxu1 }
 0x614   : > { %v693_v7 = vpop.f32.mrf.mxu1 }
 0x616   : > { %v1343_v8 = vpop.f32.mrf.mxu1 }
 0x618   : > { %v792_v9 = vpop.f32.mrf.mxu1 }
 0x619   : > { %v793_v10 = vadd.f32 %v1581_v5, %v792_v9 }
 0x61a   : > { %v1354_v11 = vpop.f32.mrf.mxu1 }
 0x61b   : > { %v798_v12 = vsel %vm462_vm2, %v793_v10, -inf }
 0x61c   : > { %799 = vmax.xlane.f32.xlu1 %v798_v12  ;;  %v795_v13 = vpop.f32.mrf.mxu1 }
 0x61d   : > { %v1100_v13 = vld [vmem:[%s392_s22] sm:$0xff] }
 0x61e   : > { %v1355_v14 = vpop.f32.mrf.mxu1 }
 0x62d   : > { %815 = vrot.lane.b32.xlu1 %v1273_v16, %s1483_s13 }
 0x631   : > { %817 = vrot.lane.b32.xlu1 %v1274_v17, %s1483_s13 }
 0x635   : > { %925 = vrot.lane.b32.xlu1 %v1565_v1, %s1484_s14  ;;  %s399_s14 = scalar_lea.vmem %s1711_s8, %s1556_s9 }
 0x639   : > { %923 = vrot.lane.b32.xlu1 %v1589_v19, %s1485_s15 }
 0x6a5   : > { %v800_v18 = vpop.xlane.xlu1 %799 }
 0x6a6   : > { %v801_v20 = vsub.f32 %v793_v10, %v800_v18  ;;  %v1283_v10 = vld [vmem:[%s1708_s5] ss:$0 sm:$0xff] }
 0x6a8   : > { %v802_v21 = vmul.f32 1.442695, %v801_v20 }
 0x6a9   : > { %v816_v24 = vpop.permute.xlu1 %815 }
 0x6aa   : > { %1440 = vpow2.f32 %v802_v21 }
 0x6ad   : > { %v818_v25 = vpop.permute.xlu1 %817 }
 0x6ae   : > { %v820_v26 = vsel %vm462_vm2, %v816_v24, %v818_v25 }
 0x6af   : > { %v825_v27 = vsel %vm480_vm3, %v820_v26, 0 }
 0x6b0   : > { %1357 = vmatpush3.bf16.msra.mxu0 %v825_v27 }
 0x6b1   : > { %1368 = vmatprep.subr.bf16.mxu0 %v1474_v0  ;;  %v926_v28 = vpop.permute.xlu1 %925 }
 0x6b2   : > { %v931_v30 = vsel %vm415_vm1, %v926_v28, 0 }
 0x6b5   : > { %v924_v32 = vpop.permute.xlu1 %923 }
 0x6b7   : > { %v1441_v22 = vpop.eup %1440 }
 0x6b8   : > { %v804_v23 = vsel %vm462_vm2, %v1441_v22, 0.0 }
 0x6b9   : > { %805 = vadd.xlane.f32.xlu0 %v804_v23 }
 0x742   : > { %v806_v1 = vpop.xlane.xlu0 %805 }
 0x743   : > { %1442 = vrcp.f32 %v806_v1 }
 0x750   : > { %v1443_v19 = vpop.eup %1442 }
 0x751   : > { %v808_v29 = vmul.f32 %v1443_v19, %v1441_v22  ;;  %v1284_v19 = vld [vmem:[%s1709_s6] ss:$0 sm:$0xff] }
 0x753   : > { %v809_v31 = vpack.c.bf16 %v808_v29, %v808_v29  ;;  %v1285_v29 = vld [vmem:[%s1710_s7] ss:$0 sm:$0xff] }
 0x755   : > { %1359 = vmatmul.mubr.msk.bf16.vlgmr.msra.gmra.mxu0 %vm462_vm2, %v809_v31 }
 0x756   : > { %1369 = vmatpush3.bf16.xpose.msra.mxu0 %v931_v30  ;;  %1370 = vmatprep.mubr.msk.bf16.mxu0 %vm1475_vm0, %v1474_v0 }
 0x757   : > { %1380 = vmatprep.subr.bf16.mxu0 %v1474_v0 }
 0x75d   : > { %1371 = vmatmul.mubr.msk.bf16.vlgmr.msra.gmra.mxu0 %vm415_vm1, %v924_v32 }
 0x75e   : > { %1382 = vmatprep.mubr.msk.bf16.mxu0 %vm1475_vm0, %v1474_v0  ;;  %1381 = vmatpush3.bf16.msra.mxu0 %v1049_v58 }
 0x815   : > { %v861_v35 = vpop.f32.mrf.mxu0 }
 0x816   : > { %v867_v36 = vpack.c.bf16 %v861_v35, %v861_v35 }
 0x817   : > { %v1360_v37 = vpop.f32.mrf.mxu0 }
 0x818   : > { %1365 = vmatmul.mubr.msk.bf16.vlgmr.msra.gmra.mxu1 %vm415_vm1, %v867_v36 }
 0x819   : > { %v864_v38 = vpop.f32.mrf.mxu0  ;;  %1376 = vmatprep.mubr.msk.bf16.mxu1 %vm1475_vm0, %v1474_v0  ;;  %v1430_v0 = vld [vmem:[%s1562_s12 + $0x4] ss:$0 sps:$4 sm:$0xff]  }
 0x81b   : > { %v1361_v39 = vpop.f32.mrf.mxu0 }
 0x81d   : > { %v967_v40 = vpop.f32.mrf.mxu0 }
 0x81e   : > { %v968_v41 = vadd.f32 %v1581_v5, %v967_v40  ;;  %v742_v5 = vadd.f32 %v1629_v61, %v1634_v4 }
 0x81f   : > { %v1372_v42 = vpop.f32.mrf.mxu0 }
 0x820   : > { %v973_v43 = vsel %vm462_vm2, %v968_v41, -inf }
 0x821   : > { %974 = vmax.xlane.f32.xlu1 %v973_v43  ;;  %v970_v44 = vpop.f32.mrf.mxu0 }
 0x823   : > { %v1373_v45 = vpop.f32.mrf.mxu0 }
 0x8aa   : > { %v975_v46 = vpop.xlane.xlu1 %974 }
 0x8ab   : > { %v976_v47 = vsub.f32 %v968_v41, %v975_v46 }
 0x8ad   : > { %v977_v48 = vmul.f32 1.442695, %v976_v47 }
 0x8af   : > { %1444 = vpow2.f32 %v977_v48 }
 0x8bc   : > { %v1445_v49 = vpop.eup %1444 }
 0x8bd   : > { %v979_v50 = vsel %vm462_vm2, %v1445_v49, 0.0 }
 0x8be   : > { %980 = vadd.xlane.f32.xlu0 %v979_v50 }
 0x8d4   : > { %988 = vrot.lane.b32.xlu0 %v1430_v0, %s1486_s18 }
 0x8d8   : > { %v915_v51 = vpop.f32.mrf.mxu1 }
 0x8d9   : > { %v921_v52 = vadd.f32 %v915_v51, %v742_v5 }
 0x8da   : > { %v1366_v53 = vpop.f32.mrf.mxu1 }
 0x8dc   : > { %v918_v55 = vpop.f32.mrf.mxu1 }
 0x8de   : > { %v1367_v57 = vpop.f32.mrf.mxu1 }
 0x947   : > { %v981_v59 = vpop.xlane.xlu0 %980 }
 0x948   : > { %1446 = vrcp.f32 %v981_v59 }
 0x94b   : > { %v989_v60 = vpop.permute.xlu0 %988 }
 0x94c   : > { %v994_v62 = vsel %vm480_vm3, %v989_v60, 0 }
 0x94d   : > { %1375 = vmatpush3.bf16.msra.mxu1 %v994_v62 }
 0x955   : > { %v1447_v61 = vpop.eup %1446 }
 0x956   : > { %v983_v63 = vmul.f32 %v1447_v61, %v1445_v49 }
 0x958   : > { %v984_v2 = vpack.c.bf16 %v983_v63, %v983_v63 }
 0x95a   : > { %1377 = vmatmul.mubr.msk.bf16.vlgmr.msra.gmra.mxu1 %vm462_vm2, %v984_v2 }
 0xa1a   : > { %v1030_v3 = vpop.f32.mrf.mxu1 }
 0xa1b   : > { %v1036_v4 = vpack.c.bf16 %v1030_v3, %v1030_v3 }
 0xa1c   : > { %v1378_v6 = vpop.f32.mrf.mxu1 }
 0xa1d   : > { %1383 = vmatmul.mubr.msk.bf16.vlgmr.msra.gmra.mxu0 %vm415_vm1, %v1036_v4 }
 0xa1e   : > { %v1033_v7 = vpop.f32.mrf.mxu1 }
 0xa20   : > { %v1379_v8 = vpop.f32.mrf.mxu1 }
 0xadd   : > { %v1085_v9 = vpop.f32.mrf.mxu0 }
 0xade   : > { %v1091_v11 = vadd.f32 %v1085_v9, %v921_v52 }
 0xadf   : > { %v1384_v12 = vpop.f32.mrf.mxu0 }
 0xae0   : > { %v1099_v14 = vadd.f32 %v1283_v10, %v1091_v11 }
 0xae1   : > { %v1088_v15 = vpop.f32.mrf.mxu0 }
 0xae2   : > { %v1101_v16 = vadd.f32 %v1100_v13, %v1099_v14 }
 0xae3   : > { %v1385_v17 = vpop.f32.mrf.mxu0 }
 0xae4   : > { %v1103_v18 = vsel %vm1102_vm5, %v1101_v16, 0.0 }
 0xae5   : > { %1104 = vadd.xlane.f32.xlu0 %v1103_v18 }
 0xb6e   : > { %v1105_v20 = vpop.xlane.xlu0 %1104 }
 0xb6f   : > { %v1107_v21 = vmul.f32 0.020833334, %v1105_v20 }
 0xb71   : > { %v1108_v22 = vsub.f32 %v1101_v16, %v1107_v21 }
 0xb73   : > { %v1109_v23 = vmul.f32 %v1108_v22, %v1108_v22 }
 0xb75   : > { %v1110_v24 = vsel %vm1102_vm5, %v1109_v23, 0.0 }
 0xb76   : > { %1111 = vadd.xlane.f32.xlu1 %v1110_v24 }
 0xbff   : > { %v1112_v25 = vpop.xlane.xlu1 %1111 }
 0xc00   : > { %v1113_v26 = vmul.f32 0.020833334, %v1112_v25 }
 0xc02   : > { %v1114_v27 = vadd.f32 1e-05, %v1113_v26 }
 0xc04   : > { %1448 = vrsqrt.f32 %v1114_v27 }
 0xc11   : > { %v1449_v1 = vpop.eup %1448 }
 0xc12   : > { %v1116_v28 = vmul.f32 %v1449_v1, %v1108_v22 }
 0xc14   : > { %v1124_v30 = vmul.f32 %v1284_v19, %v1116_v28 }
 0xc16   : > { %v1132_v31 = vadd.f32 %v1285_v29, %v1124_v30 }
 0xc18   : > { %1133 = vst.msk [vmem:[%s399_s14] sm:$0xff] %vm1102_vm5, %v1132_v31 }
 0xc19 PF: > { %s18_s29 = sadd.s32 1, %s1472_s29   ;;  %s1712_s27 = smov %s1468_s28 }
 0xc1a   : > { %p15_p5 = scmp.ge.s32.totalorder %s18_s29, 4   ;;  %s1713_s28 = smov %s1715_s30 }
 0xc1c   :  { %17 = sbr.rel (!%p15_p5) target bundleno = 2 (0x2), region = 91 }

</bundles_post_ra>
